<compile_context>
chip_gen: v7x
topology: tpu7x:2x2x1
jax: 0.10.0
libtpu: 0.0.40
codegen_flags: <defaults>
</compile_context>

<pallas_src>
import functools
import math

import jax
import jax.numpy as jnp
from jax.experimental import pallas as pl
from jax.experimental.pallas import tpu as pltpu


VMEM_LIMIT = 48 * 1024 * 1024  # below v7x 64 MiB physical, above scoped defaults
_INV_SQRT2 = 0.7071067811865476


# ----------------------------------------------------------------------------
# Tile selection helper
# ----------------------------------------------------------------------------

def _pick(dim, pref, quantum):
    """Largest multiple of `quantum` that divides `dim` and is <= pref.

    Falls back to the full dimension (always legal: block == array dim).
    """
    if dim <= pref:
        return dim
    t = (pref // quantum) * quantum
    while t >= quantum:
        if dim % t == 0:
            return t
        t -= quantum
    return dim


def _erf_gelu(y):
    # exact erf GELU, matching torch.nn.functional.gelu default
    return 0.5 * y * (1.0 + jax.lax.erf(y * _INV_SQRT2))


# ----------------------------------------------------------------------------
# Weight-resident matmul (+ bias, optional GELU)
# ----------------------------------------------------------------------------

def _matmul_kernel(x_ref, w_ref, b_ref, o_ref, *, activation):
    y = jnp.dot(x_ref[...], w_ref[...], preferred_element_type=jnp.float32)
    y = y + b_ref[...].astype(jnp.float32)
    if activation == "gelu":
        y = _erf_gelu(y)
    o_ref[...] = y.astype(o_ref.dtype)


def matmul(x, w, b, activation=None):
    """y = act(x @ w + b); x:[M,K] bf16, w:[K,N] bf16, b:[N] f32 -> [M,N].

    Grid = (N-column blocks, M tiles) with the column axis OUTER so each
    weight column block is DMA'd once and stays VMEM-resident while the M
    tiles stream past it.  K is never tiled (full-depth dot per step).
    """
    M, K = x.shape
    N = w.shape[1]
    tm = _pick(M, 512, 8)
    tn = _pick(N, 1024, 128)
    kernel = functools.partial(_matmul_kernel, activation=activation)
    return pl.pallas_call(
        kernel,
        out_shape=jax.ShapeDtypeStruct((M, N), x.dtype),
        grid=(N // tn, M // tm),
        in_specs=[
            pl.BlockSpec((tm, K), lambda j, i: (i, 0)),   # activations stream
            pl.BlockSpec((K, tn), lambda j, i: (0, j)),   # weight resident per j
            pl.BlockSpec((1, tn), lambda j, i: (0, j)),
        ],
        out_specs=pl.BlockSpec((tm, tn), lambda j, i: (i, j)),
        compiler_params=pltpu.CompilerParams(
            dimension_semantics=("arbitrary", "parallel"),
            vmem_limit_bytes=VMEM_LIMIT),
    )(x, w, b.reshape(1, N))


# ----------------------------------------------------------------------------
# Weight-resident matmul fused with residual-add + LayerNorm epilogue
# ----------------------------------------------------------------------------

def _matmul_add_ln_kernel(x_ref, w_ref, b_ref, r_ref, g_ref, bt_ref, o_ref,
                          *, eps):
    y = jnp.dot(x_ref[...], w_ref[...], preferred_element_type=jnp.float32)
    y = (y + b_ref[...].astype(jnp.float32) + r_ref[...].astype(jnp.float32))
    mu = jnp.mean(y, axis=-1, keepdims=True)
    var = jnp.mean((y - mu) * (y - mu), axis=-1, keepdims=True)
    y = (y - mu) * jax.lax.rsqrt(var + eps)
    y = y * g_ref[...].astype(jnp.float32) + bt_ref[...].astype(jnp.float32)
    o_ref[...] = y.astype(o_ref.dtype)


def matmul_add_layernorm(x, w, b, residual, gamma, beta, eps=1e-5):
    """LayerNorm(x @ w + b + residual) * gamma + beta (post-LN, fairseq)."""
    M, K = x.shape
    N = w.shape[1]
    tm = _pick(M, 512, 8)
    kernel = functools.partial(_matmul_add_ln_kernel, eps=eps)
    return pl.pallas_call(
        kernel,
        out_shape=jax.ShapeDtypeStruct((M, N), x.dtype),
        grid=(M // tm,),
        in_specs=[
            pl.BlockSpec((tm, K), lambda i: (i, 0)),
            pl.BlockSpec((K, N), lambda i: (0, 0)),      # weight VMEM-resident
            pl.BlockSpec((1, N), lambda i: (0, 0)),
            pl.BlockSpec((tm, N), lambda i: (i, 0)),
            pl.BlockSpec((1, N), lambda i: (0, 0)),
            pl.BlockSpec((1, N), lambda i: (0, 0)),
        ],
        out_specs=pl.BlockSpec((tm, N), lambda i: (i, 0)),
        compiler_params=pltpu.CompilerParams(
            dimension_semantics=("parallel",),
            vmem_limit_bytes=VMEM_LIMIT),
    )(x, w, b.reshape(1, N), residual, gamma.reshape(1, N), beta.reshape(1, N))


# ----------------------------------------------------------------------------
# Fully fused FFN block: GELU(x@W1+b1)@W2 + b2 + x -> LayerNorm
# ----------------------------------------------------------------------------

def _ffn_block_kernel(x_ref, w1_ref, b1_ref, w2_ref, b2_ref, g_ref, bt_ref,
                      o_ref, *, eps):
    x = x_ref[...]
    h = jnp.dot(x, w1_ref[...], preferred_element_type=jnp.float32)
    h = _erf_gelu(h + b1_ref[...].astype(jnp.float32))
    y = jnp.dot(h.astype(x.dtype), w2_ref[...],
                preferred_element_type=jnp.float32)
    y = y + b2_ref[...].astype(jnp.float32) + x.astype(jnp.float32)
    mu = jnp.mean(y, axis=-1, keepdims=True)
    var = jnp.mean((y - mu) * (y - mu), axis=-1, keepdims=True)
    y = (y - mu) * jax.lax.rsqrt(var + eps)
    y = y * g_ref[...].astype(jnp.float32) + bt_ref[...].astype(jnp.float32)
    o_ref[...] = y.astype(o_ref.dtype)


def ffn_block(x, w1, b1, w2, b2, gamma, beta, eps=1e-5):
    """One-kernel FFN: the [M, FFN] intermediate never leaves VMEM."""
    M, H = x.shape
    F = w1.shape[1]
    tm = _pick(M, 256, 8)     # keeps (tm, FFN) f32 intermediate ~4 MiB at FFN=4096
    kernel = functools.partial(_ffn_block_kernel, eps=eps)
    return pl.pallas_call(
        kernel,
        out_shape=jax.ShapeDtypeStruct((M, H), x.dtype),
        grid=(M // tm,),
        in_specs=[
            pl.BlockSpec((tm, H), lambda i: (i, 0)),
            pl.BlockSpec((H, F), lambda i: (0, 0)),      # W1 resident
            pl.BlockSpec((1, F), lambda i: (0, 0)),
            pl.BlockSpec((F, H), lambda i: (0, 0)),      # W2 resident
            pl.BlockSpec((1, H), lambda i: (0, 0)),
            pl.BlockSpec((1, H), lambda i: (0, 0)),
            pl.BlockSpec((1, H), lambda i: (0, 0)),
        ],
        out_specs=pl.BlockSpec((tm, H), lambda i: (i, 0)),
        compiler_params=pltpu.CompilerParams(
            dimension_semantics=("parallel",),
            vmem_limit_bytes=VMEM_LIMIT),
    )(x, w1, b1.reshape(1, F), w2, b2.reshape(1, H),
      gamma.reshape(1, H), beta.reshape(1, H))


# ----------------------------------------------------------------------------
# LayerNorm-only kernel (embedding LN; no residual stream)
# ----------------------------------------------------------------------------

def _ln_kernel(x_ref, g_ref, b_ref, o_ref, *, eps):
    x = x_ref[...].astype(jnp.float32)
    mu = jnp.mean(x, axis=-1, keepdims=True)
    var = jnp.mean((x - mu) * (x - mu), axis=-1, keepdims=True)
    y = (x - mu) * jax.lax.rsqrt(var + eps)
    y = y * g_ref[...].astype(jnp.float32) + b_ref[...].astype(jnp.float32)
    o_ref[...] = y.astype(o_ref.dtype)


def layernorm(x, gamma, beta, eps=1e-5):
    M, N = x.shape
    tm = _pick(M, 512, 8)
    kernel = functools.partial(_ln_kernel, eps=eps)
    return pl.pallas_call(
        kernel,
        out_shape=jax.ShapeDtypeStruct((M, N), x.dtype),
        grid=(M // tm,),
        in_specs=[
            pl.BlockSpec((tm, N), lambda i: (i, 0)),
            pl.BlockSpec((1, N), lambda i: (0, 0)),
            pl.BlockSpec((1, N), lambda i: (0, 0)),
        ],
        out_specs=pl.BlockSpec((tm, N), lambda i: (i, 0)),
        compiler_params=pltpu.CompilerParams(
            dimension_semantics=("parallel",)),
    )(x, gamma.reshape(1, N), beta.reshape(1, N))


# ----------------------------------------------------------------------------
# Multi-head self-attention over the fused QKV tensor (full-T K/V blocks)
# ----------------------------------------------------------------------------

def _attn_kernel(q_ref, k_ref, v_ref, o_ref, *, n_heads):
    # q_ref: (1, tq, H)   k_ref/v_ref: (1, T, H)   o_ref: (1, tq, H)
    # The 1/sqrt(dh) scale is already folded into the Q projection weights.
    H = q_ref.shape[2]
    dh = H // n_heads
    outs = []
    for h in range(n_heads):
        lo = h * dh
        qh = q_ref[0, :, lo:lo + dh]                       # (tq, dh)  bf16
        kh = k_ref[0, :, lo:lo + dh]                       # (T,  dh)  bf16
        vh = v_ref[0, :, lo:lo + dh]                       # (T,  dh)  bf16
        s = jax.lax.dot_general(
            qh, kh, (((1,), (1,)), ((), ())),
            preferred_element_type=jnp.float32)            # (tq, T) f32
        m = jnp.max(s, axis=-1, keepdims=True)
        p = jnp.exp(s - m)
        l = jnp.sum(p, axis=-1, keepdims=True)
        oh = jnp.dot(p.astype(vh.dtype), vh,
                     preferred_element_type=jnp.float32)   # (tq, dh)
        outs.append(oh * pl.reciprocal(l, approx=True))
    # Single lane-dense store of the merged (tq, H) slab.
    o_ref[0] = jnp.concatenate(outs, axis=-1).astype(o_ref.dtype)


def fused_attention(qkv, *, n_heads):
    """qkv: [B, T, 3H] (Q|K|V concatenated on lanes) -> [B, T, H]."""
    B, T, threeH = qkv.shape
    H = threeH // 3
    tq = _pick(T, 256, 8)
    # TODO(synk): for very long sequences (T >> 2k) an online-softmax kv-tiled
    # variant would be needed; XLM-R sequence lengths fit full-T K/V in VMEM.
    kernel = functools.partial(_attn_kernel, n_heads=n_heads)
    return pl.pallas_call(
        kernel,
        out_shape=jax.ShapeDtypeStruct((B, T, H), qkv.dtype),
        grid=(B, T // tq),
        in_specs=[
            # Same fused-QKV array passed three times; last-dim block index
            # 0/1/2 selects the Q / K / V lane-slabs without any JAX slicing.
            pl.BlockSpec((1, tq, H), lambda b, qi: (b, qi, 0)),
            pl.BlockSpec((1, T, H), lambda b, qi: (b, 0, 1)),
            pl.BlockSpec((1, T, H), lambda b, qi: (b, 0, 2)),
        ],
        out_specs=pl.BlockSpec((1, tq, H), lambda b, qi: (b, qi, 0)),
        compiler_params=pltpu.CompilerParams(
            dimension_semantics=("parallel", "parallel"),
            vmem_limit_bytes=VMEM_LIMIT),
    )(qkv, qkv, qkv)


# ----------------------------------------------------------------------------
# XLM-R style encoder (post-LN RoBERTa layers), parameters built in-script
# ----------------------------------------------------------------------------

def init_params(key, *, vocab, max_pos, hidden, ffn, n_layers, n_heads):
    def dense(k, shape):
        return (0.02 * jax.random.normal(k, shape, dtype=jnp.float32)
                ).astype(jnp.bfloat16)

    dh = hidden // n_heads
    q_scale = 1.0 / math.sqrt(dh)

    keys = iter(jax.random.split(key, 4 + 8 * n_layers))
    params = {
        "tok_emb": dense(next(keys), (vocab, hidden)),
        "pos_emb": dense(next(keys), (max_pos, hidden)),
        "emb_ln_g": jnp.ones((hidden,), jnp.float32),
        "emb_ln_b": jnp.zeros((hidden,), jnp.float32),
        "layers": [],
    }
    for _ in range(n_layers):
        w_qkv = dense(next(keys), (hidden, 3 * hidden))
        b_qkv = jnp.zeros((3 * hidden,), jnp.float32)
        # Fold the 1/sqrt(dh) attention scale into the Q projection
        # (weights and bias) so the kernel never multiplies the score tile.
        w_qkv = w_qkv.at[:, :hidden].set(w_qkv[:, :hidden] * q_scale)
        b_qkv = b_qkv.at[:hidden].set(b_qkv[:hidden] * q_scale)
        layer = {
            "w_qkv": w_qkv,
            "b_qkv": b_qkv,
            "wo": dense(next(keys), (hidden, hidden)),
            "bo": jnp.zeros((hidden,), jnp.float32),
            "attn_ln_g": jnp.ones((hidden,), jnp.float32),
            "attn_ln_b": jnp.zeros((hidden,), jnp.float32),
            "w1": dense(next(keys), (hidden, ffn)),
            "b1": jnp.zeros((ffn,), jnp.float32),
            "w2": dense(next(keys), (ffn, hidden)),
            "b2": jnp.zeros((hidden,), jnp.float32),
            "ffn_ln_g": jnp.ones((hidden,), jnp.float32),
            "ffn_ln_b": jnp.zeros((hidden,), jnp.float32),
        }
        params["layers"].append(layer)
    return params


def xlmr_extract_features(params, tokens, *, n_heads):
    """Equivalent of WrappedModule.forward -> inner.extract_features(tokens)."""
    B, T = tokens.shape
    H = params["tok_emb"].shape[1]

    # Embedding lookup + learned positional embedding (glue: gather/add).
    x = jnp.take(params["tok_emb"], tokens, axis=0)          # [B, T, H] bf16
    x = x + params["pos_emb"][:T][None, :, :]
    x = x.reshape(B * T, H)
    # Embedding LayerNorm (fairseq emb_layer_norm) — LN-only kernel.
    x = layernorm(x, params["emb_ln_g"], params["emb_ln_b"])
    # TODO(synk): dropout is identity in eval mode; key-padding/attention mask
    # and fairseq's padding_idx positional offset are omitted (assumes no pad
    # tokens in the synthetic input).

    for lyr in params["layers"]:
        # --- self-attention block ---
        residual = x
        qkv = matmul(x, lyr["w_qkv"], lyr["b_qkv"])           # [B*T, 3H]
        attn = fused_attention(qkv.reshape(B, T, 3 * H),
                               n_heads=n_heads)               # [B, T, H]
        attn = attn.reshape(B * T, H)
        x = matmul_add_layernorm(attn, lyr["wo"], lyr["bo"], residual,
                                 lyr["attn_ln_g"], lyr["attn_ln_b"])

        # --- FFN block (single fused kernel) ---
        x = ffn_block(x, lyr["w1"], lyr["b1"], lyr["w2"], lyr["b2"],
                      lyr["ffn_ln_g"], lyr["ffn_ln_b"])

    return x.reshape(B, T, H).astype(jnp.float32)             # features


# ----------------------------------------------------------------------------
# Driver
# ----------------------------------------------------------------------------

if __name__ == "__main__":
    # Small but lane-aligned shapes (real XLM-R: H=1024, nH=16, FFN=4096, T~512).
    B, T, H = 2, 16, 128
    N_HEADS, FFN, N_LAYERS = 4, 256, 2
    VOCAB, MAX_POS = 256, 64

    key = jax.random.PRNGKey(0)
    pkey, tkey = jax.random.split(key)
    params = init_params(pkey, vocab=VOCAB, max_pos=MAX_POS, hidden=H,
                         ffn=FFN, n_layers=N_LAYERS, n_heads=N_HEADS)
    tokens = jax.random.randint(tkey, (B, T), minval=1, maxval=VOCAB,
                                dtype=jnp.int32)

    fwd = jax.jit(functools.partial(xlmr_extract_features, n_heads=N_HEADS))
    out = fwd(params, tokens)
    jax.block_until_ready(out)
    assert out.shape == (B, T, H) and out.dtype == jnp.float32
    assert bool(jnp.all(jnp.isfinite(out)))
    print("KERNEL_OK")
</pallas_src>

<mosaic_0001>
module attributes {stable_mosaic.version = 11 : i64} {
  func.func @_matmul_kernel(%arg0: i32, %arg1: i32, %arg2: memref<32x128xbf16, #tpu.memory_space<vmem>>, %arg3: memref<128x384xbf16, #tpu.memory_space<vmem>>, %arg4: memref<1x384xf32, #tpu.memory_space<vmem>>, %arg5: memref<32x384xbf16, #tpu.memory_space<vmem>>) attributes {dimension_semantics = [#tpu.dimension_semantics<arbitrary>, #tpu.dimension_semantics<parallel>], iteration_bounds = array<i64: 1, 1>, scalar_prefetch = 0 : i64, scratch_operands = 0 : i64, tpu.core_type = #tpu.core_type<tc>, window_params = [{transform_indices = @transform_0, window_bounds = array<i64: 32, 128>}, {transform_indices = @transform_1, window_bounds = array<i64: 128, 384>}, {transform_indices = @transform_2, window_bounds = array<i64: 1, 384>}, {transform_indices = @transform_3, window_bounds = array<i64: 32, 384>}]} {
    %c0 = arith.constant 0 : index
    %c0_0 = arith.constant 0 : index
    %0 = vector.load %arg2[%c0, %c0_0] : memref<32x128xbf16, #tpu.memory_space<vmem>>, vector<32x128xbf16>
    %c0_1 = arith.constant 0 : index
    %c0_2 = arith.constant 0 : index
    %1 = vector.load %arg3[%c0_1, %c0_2] : memref<128x384xbf16, #tpu.memory_space<vmem>>, vector<128x384xbf16>
    %cst = arith.constant dense<0.000000e+00> : vector<32x384xf32>
    %2 = tpu.matmul %0, %1, %cst {dimension_numbers = #tpu.dot_dimension_numbers<[1], [0], [0], [1], [0, 0, 1, 1], [], []>} : vector<32x128xbf16>, vector<128x384xbf16>, vector<32x384xf32> -> vector<32x384xf32>
    %c0_3 = arith.constant 0 : index
    %c0_4 = arith.constant 0 : index
    %3 = vector.load %arg4[%c0_3, %c0_4] : memref<1x384xf32, #tpu.memory_space<vmem>>, vector<1x384xf32>
    %4 = vector.broadcast %3 : vector<1x384xf32> to vector<32x384xf32>
    %5 = arith.addf %2, %4 : vector<32x384xf32>
    %6 = arith.truncf %5 : vector<32x384xf32> to vector<32x384xbf16>
    %c0_5 = arith.constant 0 : index
    %c0_6 = arith.constant 0 : index
    %7 = vector.load %arg5[%c0_5, %c0_6] : memref<32x384xbf16, #tpu.memory_space<vmem>>, vector<32x384xbf16>
    tpu.vector_store %arg5[%c0_5, %c0_6], %6 {strides = array<i32>} : memref<32x384xbf16, #tpu.memory_space<vmem>>, vector<32x384xbf16>,
    return
  }
  func.func @transform_0(%arg0: i32, %arg1: i32) -> (i32, i32) {
    %c0_i32 = arith.constant 0 : i32
    %c0_i32_0 = arith.constant 0 : i32
    return %arg1, %c0_i32 : i32, i32
  }
  func.func @transform_1(%arg0: i32, %arg1: i32) -> (i32, i32) {
    %c0_i32 = arith.constant 0 : i32
    %c0_i32_0 = arith.constant 0 : i32
    return %c0_i32, %arg0 : i32, i32
  }
  func.func @transform_2(%arg0: i32, %arg1: i32) -> (i32, i32) {
    %c0_i32 = arith.constant 0 : i32
    %c0_i32_0 = arith.constant 0 : i32
    return %c0_i32, %arg0 : i32, i32
  }
  func.func @transform_3(%arg0: i32, %arg1: i32) -> (i32, i32) {
    %c0_i32 = arith.constant 0 : i32
    return %arg1, %arg0 : i32, i32
  }
}

module attributes {stable_mosaic.version = 11 : i64} {
  func.func @_ln_kernel(%arg0: i32, %arg1: memref<32x128xbf16, #tpu.memory_space<vmem>>, %arg2: memref<1x128xf32, #tpu.memory_space<vmem>>, %arg3: memref<1x128xf32, #tpu.memory_space<vmem>>, %arg4: memref<32x128xbf16, #tpu.memory_space<vmem>>) attributes {dimension_semantics = [#tpu.dimension_semantics<parallel>], iteration_bounds = array<i64: 1>, scalar_prefetch = 0 : i64, scratch_operands = 0 : i64, tpu.core_type = #tpu.core_type<tc>, window_params = [{transform_indices = @transform_0, window_bounds = array<i64: 32, 128>}, {pipeline_mode = #tpu.pipeline_mode<synchronous>, transform_indices = @transform_1, window_bounds = array<i64: 1, 128>}, {pipeline_mode = #tpu.pipeline_mode<synchronous>, transform_indices = @transform_2, window_bounds = array<i64: 1, 128>}, {transform_indices = @transform_3, window_bounds = array<i64: 32, 128>}]} {
    %c0 = arith.constant 0 : index
    %c0_0 = arith.constant 0 : index
    %0 = vector.load %arg1[%c0, %c0_0] : memref<32x128xbf16, #tpu.memory_space<vmem>>, vector<32x128xbf16>
    %1 = arith.extf %0 : vector<32x128xbf16> to vector<32x128xf32>
    %cst = arith.constant dense<0.000000e+00> : vector<32xf32>
    %2 = vector.multi_reduction <add>, %1, %cst [1] : vector<32x128xf32> to vector<32xf32>
    %3 = vector.shape_cast %2 : vector<32xf32> to vector<32x1xf32>
    %cst_1 = arith.constant 1.280000e+02 : f32
    %4 = vector.broadcast %cst_1 : f32 to vector<32x1xf32>
    %5 = arith.divf %3, %4 : vector<32x1xf32>
    %6 = vector.broadcast %5 : vector<32x1xf32> to vector<32x128xf32>
    %7 = arith.subf %1, %6 : vector<32x128xf32>
    %8 = vector.broadcast %5 : vector<32x1xf32> to vector<32x128xf32>
    %9 = arith.subf %1, %8 : vector<32x128xf32>
    %10 = arith.mulf %7, %9 : vector<32x128xf32>
    %cst_2 = arith.constant dense<0.000000e+00> : vector<32xf32>
    %11 = vector.multi_reduction <add>, %10, %cst_2 [1] : vector<32x128xf32> to vector<32xf32>
    %12 = vector.shape_cast %11 : vector<32xf32> to vector<32x1xf32>
    %cst_3 = arith.constant 1.280000e+02 : f32
    %13 = vector.broadcast %cst_3 : f32 to vector<32x1xf32>
    %14 = arith.divf %12, %13 : vector<32x1xf32>
    %15 = vector.broadcast %5 : vector<32x1xf32> to vector<32x128xf32>
    %16 = arith.subf %1, %15 : vector<32x128xf32>
    %cst_4 = arith.constant 9.99999974E-6 : f32
    %17 = vector.broadcast %cst_4 : f32 to vector<32x1xf32>
    %18 = arith.addf %14, %17 : vector<32x1xf32>
    %19 = math.rsqrt %18 : vector<32x1xf32>
    %20 = vector.broadcast %19 : vector<32x1xf32> to vector<32x128xf32>
    %21 = arith.mulf %16, %20 : vector<32x128xf32>
    %c0_5 = arith.constant 0 : index
    %c0_6 = arith.constant 0 : index
    %22 = vector.load %arg2[%c0_5, %c0_6] : memref<1x128xf32, #tpu.memory_space<vmem>>, vector<1x128xf32>
    %23 = vector.broadcast %22 : vector<1x128xf32> to vector<32x128xf32>
    %24 = arith.mulf %21, %23 : vector<32x128xf32>
    %c0_7 = arith.constant 0 : index
    %c0_8 = arith.constant 0 : index
    %25 = vector.load %arg3[%c0_7, %c0_8] : memref<1x128xf32, #tpu.memory_space<vmem>>, vector<1x128xf32>
    %26 = vector.broadcast %25 : vector<1x128xf32> to vector<32x128xf32>
    %27 = arith.addf %24, %26 : vector<32x128xf32>
    %28 = arith.truncf %27 : vector<32x128xf32> to vector<32x128xbf16>
    %c0_9 = arith.constant 0 : index
    %c0_10 = arith.constant 0 : index
    %29 = vector.load %arg4[%c0_9, %c0_10] : memref<32x128xbf16, #tpu.memory_space<vmem>>, vector<32x128xbf16>
    tpu.vector_store %arg4[%c0_9, %c0_10], %28 {strides = array<i32>} : memref<32x128xbf16, #tpu.memory_space<vmem>>, vector<32x128xbf16>,
    return
  }
  func.func @transform_0(%arg0: i32) -> (i32, i32) {
    %c0_i32 = arith.constant 0 : i32
    %c0_i32_0 = arith.constant 0 : i32
    return %arg0, %c0_i32 : i32, i32
  }
  func.func @transform_1(%arg0: i32) -> (i32, i32) {
    %c0_i32 = arith.constant 0 : i32
    %c0_i32_0 = arith.constant 0 : i32
    %c0_i32_1 = arith.constant 0 : i32
    return %c0_i32, %c0_i32_0 : i32, i32
  }
  func.func @transform_2(%arg0: i32) -> (i32, i32) {
    %c0_i32 = arith.constant 0 : i32
    %c0_i32_0 = arith.constant 0 : i32
    %c0_i32_1 = arith.constant 0 : i32
    return %c0_i32, %c0_i32_0 : i32, i32
  }
  func.func @transform_3(%arg0: i32) -> (i32, i32) {
    %c0_i32 = arith.constant 0 : i32
    %c0_i32_0 = arith.constant 0 : i32
    return %arg0, %c0_i32 : i32, i32
  }
}

module attributes {stable_mosaic.version = 11 : i64} {
  func.func @_attn_kernel(%arg0: i32, %arg1: i32, %arg2: memref<1x16x128xbf16, #tpu.memory_space<vmem>>, %arg3: memref<1x16x128xbf16, #tpu.memory_space<vmem>>, %arg4: memref<1x16x128xbf16, #tpu.memory_space<vmem>>, %arg5: memref<1x16x128xbf16, #tpu.memory_space<vmem>>) attributes {dimension_semantics = [#tpu.dimension_semantics<parallel>, #tpu.dimension_semantics<parallel>], iteration_bounds = array<i64: 2, 1>, scalar_prefetch = 0 : i64, scratch_operands = 0 : i64, tpu.core_type = #tpu.core_type<tc>, window_params = [{transform_indices = @transform_0, window_bounds = array<i64: 1, 16, 128>}, {transform_indices = @transform_1, window_bounds = array<i64: 1, 16, 128>}, {transform_indices = @transform_2, window_bounds = array<i64: 1, 16, 128>}, {transform_indices = @transform_3, window_bounds = array<i64: 1, 16, 128>}]} {
    %c0 = arith.constant 0 : index
    %c0_0 = arith.constant 0 : index
    %c0_1 = arith.constant 0 : index
    %0 = vector.load %arg2[%c0, %c0_0, %c0_1] : memref<1x16x128xbf16, #tpu.memory_space<vmem>>, vector<1x16x32xbf16>
    %1 = vector.shape_cast %0 : vector<1x16x32xbf16> to vector<16x32xbf16>
    %c0_2 = arith.constant 0 : index
    %c0_3 = arith.constant 0 : index
    %c0_4 = arith.constant 0 : index
    %2 = vector.load %arg3[%c0_2, %c0_3, %c0_4] : memref<1x16x128xbf16, #tpu.memory_space<vmem>>, vector<1x16x32xbf16>
    %3 = vector.shape_cast %2 : vector<1x16x32xbf16> to vector<16x32xbf16>
    %c0_5 = arith.constant 0 : index
    %c0_6 = arith.constant 0 : index
    %c0_7 = arith.constant 0 : index
    %4 = vector.load %arg4[%c0_5, %c0_6, %c0_7] : memref<1x16x128xbf16, #tpu.memory_space<vmem>>, vector<1x16x32xbf16>
    %5 = vector.shape_cast %4 : vector<1x16x32xbf16> to vector<16x32xbf16>
    %cst = arith.constant dense<0.000000e+00> : vector<16x16xf32>
    %6 = tpu.matmul %1, %3, %cst {dimension_numbers = #tpu.dot_dimension_numbers<[1], [1], [0], [0], [0, 0, 1, 0], [], []>} : vector<16x32xbf16>, vector<16x32xbf16>, vector<16x16xf32> -> vector<16x16xf32>
    %cst_8 = arith.constant dense<0xFF800000> : vector<16xf32>
    %7 = vector.multi_reduction <maximumf>, %6, %cst_8 [1] : vector<16x16xf32> to vector<16xf32>
    %8 = vector.shape_cast %7 : vector<16xf32> to vector<16x1xf32>
    %9 = vector.broadcast %8 : vector<16x1xf32> to vector<16x16xf32>
    %10 = arith.subf %6, %9 : vector<16x16xf32>
    %11 = math.exp %10 : vector<16x16xf32>
    %cst_9 = arith.constant dense<0.000000e+00> : vector<16xf32>
    %12 = vector.multi_reduction <add>, %11, %cst_9 [1] : vector<16x16xf32> to vector<16xf32>
    %13 = vector.shape_cast %12 : vector<16xf32> to vector<16x1xf32>
    %14 = arith.truncf %11 : vector<16x16xf32> to vector<16x16xbf16>
    %cst_10 = arith.constant dense<0.000000e+00> : vector<16x32xf32>
    %15 = tpu.matmul %14, %5, %cst_10 {dimension_numbers = #tpu.dot_dimension_numbers<[1], [0], [0], [1], [0, 0, 1, 1], [], []>} : vector<16x16xbf16>, vector<16x32xbf16>, vector<16x32xf32> -> vector<16x32xf32>
    %16 = tpu.reciprocal %13 {approx = true} : vector<16x1xf32> -> vector<16x1xf32>
    %17 = vector.broadcast %16 : vector<16x1xf32> to vector<16x32xf32>
    %18 = arith.mulf %15, %17 : vector<16x32xf32>
    %c0_11 = arith.constant 0 : index
    %c0_12 = arith.constant 0 : index
    %c32 = arith.constant 32 : index
    %19 = vector.load %arg2[%c0_11, %c0_12, %c32] : memref<1x16x128xbf16, #tpu.memory_space<vmem>>, vector<1x16x32xbf16>
    %20 = vector.shape_cast %19 : vector<1x16x32xbf16> to vector<16x32xbf16>
    %c0_13 = arith.constant 0 : index
    %c0_14 = arith.constant 0 : index
    %c32_15 = arith.constant 32 : index
    %21 = vector.load %arg3[%c0_13, %c0_14, %c32_15] : memref<1x16x128xbf16, #tpu.memory_space<vmem>>, vector<1x16x32xbf16>
    %22 = vector.shape_cast %21 : vector<1x16x32xbf16> to vector<16x32xbf16>
    %c0_16 = arith.constant 0 : index
    %c0_17 = arith.constant 0 : index
    %c32_18 = arith.constant 32 : index
    %23 = vector.load %arg4[%c0_16, %c0_17, %c32_18] : memref<1x16x128xbf16, #tpu.memory_space<vmem>>, vector<1x16x32xbf16>
    %24 = vector.shape_cast %23 : vector<1x16x32xbf16> to vector<16x32xbf16>
    %cst_19 = arith.constant dense<0.000000e+00> : vector<16x16xf32>
    %25 = tpu.matmul %20, %22, %cst_19 {dimension_numbers = #tpu.dot_dimension_numbers<[1], [1], [0], [0], [0, 0, 1, 0], [], []>} : vector<16x32xbf16>, vector<16x32xbf16>, vector<16x16xf32> -> vector<16x16xf32>
    %cst_20 = arith.constant dense<0xFF800000> : vector<16xf32>
    %26 = vector.multi_reduction <maximumf>, %25, %cst_20 [1] : vector<16x16xf32> to vector<16xf32>
    %27 = vector.shape_cast %26 : vector<16xf32> to vector<16x1xf32>
    %28 = vector.broadcast %27 : vector<16x1xf32> to vector<16x16xf32>
    %29 = arith.subf %25, %28 : vector<16x16xf32>
    %30 = math.exp %29 : vector<16x16xf32>
    %cst_21 = arith.constant dense<0.000000e+00> : vector<16xf32>
    %31 = vector.multi_reduction <add>, %30, %cst_21 [1] : vector<16x16xf32> to vector<16xf32>
    %32 = vector.shape_cast %31 : vector<16xf32> to vector<16x1xf32>
    %33 = arith.truncf %30 : vector<16x16xf32> to vector<16x16xbf16>
    %cst_22 = arith.constant dense<0.000000e+00> : vector<16x32xf32>
    %34 = tpu.matmul %33, %24, %cst_22 {dimension_numbers = #tpu.dot_dimension_numbers<[1], [0], [0], [1], [0, 0, 1, 1], [], []>} : vector<16x16xbf16>, vector<16x32xbf16>, vector<16x32xf32> -> vector<16x32xf32>
    %35 = tpu.reciprocal %32 {approx = true} : vector<16x1xf32> -> vector<16x1xf32>
    %36 = vector.broadcast %35 : vector<16x1xf32> to vector<16x32xf32>
    %37 = arith.mulf %34, %36 : vector<16x32xf32>
    %c0_23 = arith.constant 0 : index
    %c0_24 = arith.constant 0 : index
    %c64 = arith.constant 64 : index
    %38 = vector.load %arg2[%c0_23, %c0_24, %c64] : memref<1x16x128xbf16, #tpu.memory_space<vmem>>, vector<1x16x32xbf16>
    %39 = vector.shape_cast %38 : vector<1x16x32xbf16> to vector<16x32xbf16>
    %c0_25 = arith.constant 0 : index
    %c0_26 = arith.constant 0 : index
    %c64_27 = arith.constant 64 : index
    %40 = vector.load %arg3[%c0_25, %c0_26, %c64_27] : memref<1x16x128xbf16, #tpu.memory_space<vmem>>, vector<1x16x32xbf16>
    %41 = vector.shape_cast %40 : vector<1x16x32xbf16> to vector<16x32xbf16>
    %c0_28 = arith.constant 0 : index
    %c0_29 = arith.constant 0 : index
    %c64_30 = arith.constant 64 : index
    %42 = vector.load %arg4[%c0_28, %c0_29, %c64_30] : memref<1x16x128xbf16, #tpu.memory_space<vmem>>, vector<1x16x32xbf16>
    %43 = vector.shape_cast %42 : vector<1x16x32xbf16> to vector<16x32xbf16>
    %cst_31 = arith.constant dense<0.000000e+00> : vector<16x16xf32>
    %44 = tpu.matmul %39, %41, %cst_31 {dimension_numbers = #tpu.dot_dimension_numbers<[1], [1], [0], [0], [0, 0, 1, 0], [], []>} : vector<16x32xbf16>, vector<16x32xbf16>, vector<16x16xf32> -> vector<16x16xf32>
    %cst_32 = arith.constant dense<0xFF800000> : vector<16xf32>
    %45 = vector.multi_reduction <maximumf>, %44, %cst_32 [1] : vector<16x16xf32> to vector<16xf32>
    %46 = vector.shape_cast %45 : vector<16xf32> to vector<16x1xf32>
    %47 = vector.broadcast %46 : vector<16x1xf32> to vector<16x16xf32>
    %48 = arith.subf %44, %47 : vector<16x16xf32>
    %49 = math.exp %48 : vector<16x16xf32>
    %cst_33 = arith.constant dense<0.000000e+00> : vector<16xf32>
    %50 = vector.multi_reduction <add>, %49, %cst_33 [1] : vector<16x16xf32> to vector<16xf32>
    %51 = vector.shape_cast %50 : vector<16xf32> to vector<16x1xf32>
    %52 = arith.truncf %49 : vector<16x16xf32> to vector<16x16xbf16>
    %cst_34 = arith.constant dense<0.000000e+00> : vector<16x32xf32>
    %53 = tpu.matmul %52, %43, %cst_34 {dimension_numbers = #tpu.dot_dimension_numbers<[1], [0], [0], [1], [0, 0, 1, 1], [], []>} : vector<16x16xbf16>, vector<16x32xbf16>, vector<16x32xf32> -> vector<16x32xf32>
    %54 = tpu.reciprocal %51 {approx = true} : vector<16x1xf32> -> vector<16x1xf32>
    %55 = vector.broadcast %54 : vector<16x1xf32> to vector<16x32xf32>
    %56 = arith.mulf %53, %55 : vector<16x32xf32>
    %c0_35 = arith.constant 0 : index
    %c0_36 = arith.constant 0 : index
    %c96 = arith.constant 96 : index
    %57 = vector.load %arg2[%c0_35, %c0_36, %c96] : memref<1x16x128xbf16, #tpu.memory_space<vmem>>, vector<1x16x32xbf16>
    %58 = vector.shape_cast %57 : vector<1x16x32xbf16> to vector<16x32xbf16>
    %c0_37 = arith.constant 0 : index
    %c0_38 = arith.constant 0 : index
    %c96_39 = arith.constant 96 : index
    %59 = vector.load %arg3[%c0_37, %c0_38, %c96_39] : memref<1x16x128xbf16, #tpu.memory_space<vmem>>, vector<1x16x32xbf16>
    %60 = vector.shape_cast %59 : vector<1x16x32xbf16> to vector<16x32xbf16>
    %c0_40 = arith.constant 0 : index
    %c0_41 = arith.constant 0 : index
    %c96_42 = arith.constant 96 : index
    %61 = vector.load %arg4[%c0_40, %c0_41, %c96_42] : memref<1x16x128xbf16, #tpu.memory_space<vmem>>, vector<1x16x32xbf16>
    %62 = vector.shape_cast %61 : vector<1x16x32xbf16> to vector<16x32xbf16>
    %cst_43 = arith.constant dense<0.000000e+00> : vector<16x16xf32>
    %63 = tpu.matmul %58, %60, %cst_43 {dimension_numbers = #tpu.dot_dimension_numbers<[1], [1], [0], [0], [0, 0, 1, 0], [], []>} : vector<16x32xbf16>, vector<16x32xbf16>, vector<16x16xf32> -> vector<16x16xf32>
    %cst_44 = arith.constant dense<0xFF800000> : vector<16xf32>
    %64 = vector.multi_reduction <maximumf>, %63, %cst_44 [1] : vector<16x16xf32> to vector<16xf32>
    %65 = vector.shape_cast %64 : vector<16xf32> to vector<16x1xf32>
    %66 = vector.broadcast %65 : vector<16x1xf32> to vector<16x16xf32>
    %67 = arith.subf %63, %66 : vector<16x16xf32>
    %68 = math.exp %67 : vector<16x16xf32>
    %cst_45 = arith.constant dense<0.000000e+00> : vector<16xf32>
    %69 = vector.multi_reduction <add>, %68, %cst_45 [1] : vector<16x16xf32> to vector<16xf32>
    %70 = vector.shape_cast %69 : vector<16xf32> to vector<16x1xf32>
    %71 = arith.truncf %68 : vector<16x16xf32> to vector<16x16xbf16>
    %cst_46 = arith.constant dense<0.000000e+00> : vector<16x32xf32>
    %72 = tpu.matmul %71, %62, %cst_46 {dimension_numbers = #tpu.dot_dimension_numbers<[1], [0], [0], [1], [0, 0, 1, 1], [], []>} : vector<16x16xbf16>, vector<16x32xbf16>, vector<16x32xf32> -> vector<16x32xf32>
    %73 = tpu.reciprocal %70 {approx = true} : vector<16x1xf32> -> vector<16x1xf32>
    %74 = vector.broadcast %73 : vector<16x1xf32> to vector<16x32xf32>
    %75 = arith.mulf %72, %74 : vector<16x32xf32>
    %76 = tpu.concatenate %18, %37, %56, %75 in 1 : vector<16x32xf32>, vector<16x32xf32>, vector<16x32xf32>, vector<16x32xf32> -> vector<16x128xf32>
    %77 = arith.truncf %76 : vector<16x128xf32> to vector<16x128xbf16>
    %c0_47 = arith.constant 0 : index
    %c0_48 = arith.constant 0 : index
    %c0_49 = arith.constant 0 : index
    %78 = vector.load %arg5[%c0_47, %c0_48, %c0_49] : memref<1x16x128xbf16, #tpu.memory_space<vmem>>, vector<1x16x128xbf16>
    %79 = vector.shape_cast %78 : vector<1x16x128xbf16> to vector<16x128xbf16>
    %80 = vector.shape_cast %77 : vector<16x128xbf16> to vector<1x16x128xbf16>
    tpu.vector_store %arg5[%c0_47, %c0_48, %c0_49], %80 {strides = array<i32>} : memref<1x16x128xbf16, #tpu.memory_space<vmem>>, vector<1x16x128xbf16>,
    return
  }
  func.func @transform_0(%arg0: i32, %arg1: i32) -> (i32, i32, i32) {
    %c0_i32 = arith.constant 0 : i32
    %c0_i32_0 = arith.constant 0 : i32
    return %arg0, %arg1, %c0_i32 : i32, i32, i32
  }
  func.func @transform_1(%arg0: i32, %arg1: i32) -> (i32, i32, i32) {
    %c0_i32 = arith.constant 0 : i32
    %c1_i32 = arith.constant 1 : i32
    %c0_i32_0 = arith.constant 0 : i32
    return %arg0, %c0_i32, %c1_i32 : i32, i32, i32
  }
  func.func @transform_2(%arg0: i32, %arg1: i32) -> (i32, i32, i32) {
    %c0_i32 = arith.constant 0 : i32
    %c2_i32 = arith.constant 2 : i32
    %c0_i32_0 = arith.constant 0 : i32
    return %arg0, %c0_i32, %c2_i32 : i32, i32, i32
  }
  func.func @transform_3(%arg0: i32, %arg1: i32) -> (i32, i32, i32) {
    %c0_i32 = arith.constant 0 : i32
    %c0_i32_0 = arith.constant 0 : i32
    return %arg0, %arg1, %c0_i32 : i32, i32, i32
  }
}

module attributes {stable_mosaic.version = 11 : i64} {
  func.func @_matmul_add_ln_kernel(%arg0: i32, %arg1: memref<32x128xbf16, #tpu.memory_space<vmem>>, %arg2: memref<128x128xbf16, #tpu.memory_space<vmem>>, %arg3: memref<1x128xf32, #tpu.memory_space<vmem>>, %arg4: memref<32x128xbf16, #tpu.memory_space<vmem>>, %arg5: memref<1x128xf32, #tpu.memory_space<vmem>>, %arg6: memref<1x128xf32, #tpu.memory_space<vmem>>, %arg7: memref<32x128xbf16, #tpu.memory_space<vmem>>) attributes {dimension_semantics = [#tpu.dimension_semantics<parallel>], iteration_bounds = array<i64: 1>, scalar_prefetch = 0 : i64, scratch_operands = 0 : i64, tpu.core_type = #tpu.core_type<tc>, window_params = [{transform_indices = @transform_0, window_bounds = array<i64: 32, 128>}, {pipeline_mode = #tpu.pipeline_mode<synchronous>, transform_indices = @transform_1, window_bounds = array<i64: 128, 128>}, {pipeline_mode = #tpu.pipeline_mode<synchronous>, transform_indices = @transform_2, window_bounds = array<i64: 1, 128>}, {transform_indices = @transform_3, window_bounds = array<i64: 32, 128>}, {pipeline_mode = #tpu.pipeline_mode<synchronous>, transform_indices = @transform_4, window_bounds = array<i64: 1, 128>}, {pipeline_mode = #tpu.pipeline_mode<synchronous>, transform_indices = @transform_5, window_bounds = array<i64: 1, 128>}, {transform_indices = @transform_6, window_bounds = array<i64: 32, 128>}]} {
    %c0 = arith.constant 0 : index
    %c0_0 = arith.constant 0 : index
    %0 = vector.load %arg1[%c0, %c0_0] : memref<32x128xbf16, #tpu.memory_space<vmem>>, vector<32x128xbf16>
    %c0_1 = arith.constant 0 : index
    %c0_2 = arith.constant 0 : index
    %1 = vector.load %arg2[%c0_1, %c0_2] : memref<128x128xbf16, #tpu.memory_space<vmem>>, vector<128x128xbf16>
    %cst = arith.constant dense<0.000000e+00> : vector<32x128xf32>
    %2 = tpu.matmul %0, %1, %cst {dimension_numbers = #tpu.dot_dimension_numbers<[1], [0], [0], [1], [0, 0, 1, 1], [], []>} : vector<32x128xbf16>, vector<128x128xbf16>, vector<32x128xf32> -> vector<32x128xf32>
    %c0_3 = arith.constant 0 : index
    %c0_4 = arith.constant 0 : index
    %3 = vector.load %arg3[%c0_3, %c0_4] : memref<1x128xf32, #tpu.memory_space<vmem>>, vector<1x128xf32>
    %4 = vector.broadcast %3 : vector<1x128xf32> to vector<32x128xf32>
    %5 = arith.addf %2, %4 : vector<32x128xf32>
    %c0_5 = arith.constant 0 : index
    %c0_6 = arith.constant 0 : index
    %6 = vector.load %arg4[%c0_5, %c0_6] : memref<32x128xbf16, #tpu.memory_space<vmem>>, vector<32x128xbf16>
    %7 = arith.extf %6 : vector<32x128xbf16> to vector<32x128xf32>
    %8 = arith.addf %5, %7 : vector<32x128xf32>
    %cst_7 = arith.constant dense<0.000000e+00> : vector<32xf32>
    %9 = vector.multi_reduction <add>, %8, %cst_7 [1] : vector<32x128xf32> to vector<32xf32>
    %10 = vector.shape_cast %9 : vector<32xf32> to vector<32x1xf32>
    %cst_8 = arith.constant 1.280000e+02 : f32
    %11 = vector.broadcast %cst_8 : f32 to vector<32x1xf32>
    %12 = arith.divf %10, %11 : vector<32x1xf32>
    %13 = vector.broadcast %12 : vector<32x1xf32> to vector<32x128xf32>
    %14 = arith.subf %8, %13 : vector<32x128xf32>
    %15 = vector.broadcast %12 : vector<32x1xf32> to vector<32x128xf32>
    %16 = arith.subf %8, %15 : vector<32x128xf32>
    %17 = arith.mulf %14, %16 : vector<32x128xf32>
    %cst_9 = arith.constant dense<0.000000e+00> : vector<32xf32>
    %18 = vector.multi_reduction <add>, %17, %cst_9 [1] : vector<32x128xf32> to vector<32xf32>
    %19 = vector.shape_cast %18 : vector<32xf32> to vector<32x1xf32>
    %cst_10 = arith.constant 1.280000e+02 : f32
    %20 = vector.broadcast %cst_10 : f32 to vector<32x1xf32>
    %21 = arith.divf %19, %20 : vector<32x1xf32>
    %22 = vector.broadcast %12 : vector<32x1xf32> to vector<32x128xf32>
    %23 = arith.subf %8, %22 : vector<32x128xf32>
    %cst_11 = arith.constant 9.99999974E-6 : f32
    %24 = vector.broadcast %cst_11 : f32 to vector<32x1xf32>
    %25 = arith.addf %21, %24 : vector<32x1xf32>
    %26 = math.rsqrt %25 : vector<32x1xf32>
    %27 = vector.broadcast %26 : vector<32x1xf32> to vector<32x128xf32>
    %28 = arith.mulf %23, %27 : vector<32x128xf32>
    %c0_12 = arith.constant 0 : index
    %c0_13 = arith.constant 0 : index
    %29 = vector.load %arg5[%c0_12, %c0_13] : memref<1x128xf32, #tpu.memory_space<vmem>>, vector<1x128xf32>
    %30 = vector.broadcast %29 : vector<1x128xf32> to vector<32x128xf32>
    %31 = arith.mulf %28, %30 : vector<32x128xf32>
    %c0_14 = arith.constant 0 : index
    %c0_15 = arith.constant 0 : index
    %32 = vector.load %arg6[%c0_14, %c0_15] : memref<1x128xf32, #tpu.memory_space<vmem>>, vector<1x128xf32>
    %33 = vector.broadcast %32 : vector<1x128xf32> to vector<32x128xf32>
    %34 = arith.addf %31, %33 : vector<32x128xf32>
    %35 = arith.truncf %34 : vector<32x128xf32> to vector<32x128xbf16>
    %c0_16 = arith.constant 0 : index
    %c0_17 = arith.constant 0 : index
    %36 = vector.load %arg7[%c0_16, %c0_17] : memref<32x128xbf16, #tpu.memory_space<vmem>>, vector<32x128xbf16>
    tpu.vector_store %arg7[%c0_16, %c0_17], %35 {strides = array<i32>} : memref<32x128xbf16, #tpu.memory_space<vmem>>, vector<32x128xbf16>,
    return
  }
  func.func @transform_0(%arg0: i32) -> (i32, i32) {
    %c0_i32 = arith.constant 0 : i32
    %c0_i32_0 = arith.constant 0 : i32
    return %arg0, %c0_i32 : i32, i32
  }
  func.func @transform_1(%arg0: i32) -> (i32, i32) {
    %c0_i32 = arith.constant 0 : i32
    %c0_i32_0 = arith.constant 0 : i32
    %c0_i32_1 = arith.constant 0 : i32
    return %c0_i32, %c0_i32_0 : i32, i32
  }
  func.func @transform_2(%arg0: i32) -> (i32, i32) {
    %c0_i32 = arith.constant 0 : i32
    %c0_i32_0 = arith.constant 0 : i32
    %c0_i32_1 = arith.constant 0 : i32
    return %c0_i32, %c0_i32_0 : i32, i32
  }
  func.func @transform_3(%arg0: i32) -> (i32, i32) {
    %c0_i32 = arith.constant 0 : i32
    %c0_i32_0 = arith.constant 0 : i32
    return %arg0, %c0_i32 : i32, i32
  }
  func.func @transform_4(%arg0: i32) -> (i32, i32) {
    %c0_i32 = arith.constant 0 : i32
    %c0_i32_0 = arith.constant 0 : i32
    %c0_i32_1 = arith.constant 0 : i32
    return %c0_i32, %c0_i32_0 : i32, i32
  }
  func.func @transform_5(%arg0: i32) -> (i32, i32) {
    %c0_i32 = arith.constant 0 : i32
    %c0_i32_0 = arith.constant 0 : i32
    %c0_i32_1 = arith.constant 0 : i32
    return %c0_i32, %c0_i32_0 : i32, i32
  }
  func.func @transform_6(%arg0: i32) -> (i32, i32) {
    %c0_i32 = arith.constant 0 : i32
    %c0_i32_0 = arith.constant 0 : i32
    return %arg0, %c0_i32 : i32, i32
  }
}

module attributes {stable_mosaic.version = 11 : i64} {
  func.func @_ffn_block_kernel(%arg0: i32, %arg1: memref<32x128xbf16, #tpu.memory_space<vmem>>, %arg2: memref<128x256xbf16, #tpu.memory_space<vmem>>, %arg3: memref<1x256xf32, #tpu.memory_space<vmem>>, %arg4: memref<256x128xbf16, #tpu.memory_space<vmem>>, %arg5: memref<1x128xf32, #tpu.memory_space<vmem>>, %arg6: memref<1x128xf32, #tpu.memory_space<vmem>>, %arg7: memref<1x128xf32, #tpu.memory_space<vmem>>, %arg8: memref<32x128xbf16, #tpu.memory_space<vmem>>) attributes {dimension_semantics = [#tpu.dimension_semantics<parallel>], iteration_bounds = array<i64: 1>, scalar_prefetch = 0 : i64, scratch_operands = 0 : i64, tpu.core_type = #tpu.core_type<tc>, window_params = [{transform_indices = @transform_0, window_bounds = array<i64: 32, 128>}, {pipeline_mode = #tpu.pipeline_mode<synchronous>, transform_indices = @transform_1, window_bounds = array<i64: 128, 256>}, {pipeline_mode = #tpu.pipeline_mode<synchronous>, transform_indices = @transform_2, window_bounds = array<i64: 1, 256>}, {pipeline_mode = #tpu.pipeline_mode<synchronous>, transform_indices = @transform_3, window_bounds = array<i64: 256, 128>}, {pipeline_mode = #tpu.pipeline_mode<synchronous>, transform_indices = @transform_4, window_bounds = array<i64: 1, 128>}, {pipeline_mode = #tpu.pipeline_mode<synchronous>, transform_indices = @transform_5, window_bounds = array<i64: 1, 128>}, {pipeline_mode = #tpu.pipeline_mode<synchronous>, transform_indices = @transform_6, window_bounds = array<i64: 1, 128>}, {transform_indices = @transform_7, window_bounds = array<i64: 32, 128>}]} {
    %c0 = arith.constant 0 : index
    %c0_0 = arith.constant 0 : index
    %0 = vector.load %arg1[%c0, %c0_0] : memref<32x128xbf16, #tpu.memory_space<vmem>>, vector<32x128xbf16>
    %c0_1 = arith.constant 0 : index
    %c0_2 = arith.constant 0 : index
    %1 = vector.load %arg2[%c0_1, %c0_2] : memref<128x256xbf16, #tpu.memory_space<vmem>>, vector<128x256xbf16>
    %cst = arith.constant dense<0.000000e+00> : vector<32x256xf32>
    %2 = tpu.matmul %0, %1, %cst {dimension_numbers = #tpu.dot_dimension_numbers<[1], [0], [0], [1], [0, 0, 1, 1], [], []>} : vector<32x128xbf16>, vector<128x256xbf16>, vector<32x256xf32> -> vector<32x256xf32>
    %c0_3 = arith.constant 0 : index
    %c0_4 = arith.constant 0 : index
    %3 = vector.load %arg3[%c0_3, %c0_4] : memref<1x256xf32, #tpu.memory_space<vmem>>, vector<1x256xf32>
    %4 = vector.broadcast %3 : vector<1x256xf32> to vector<32x256xf32>
    %5 = arith.addf %2, %4 : vector<32x256xf32>
    %cst_5 = arith.constant 5.000000e-01 : f32
    %6 = vector.broadcast %cst_5 : f32 to vector<32x256xf32>
    %7 = arith.mulf %6, %5 : vector<32x256xf32>
    %cst_6 = arith.constant 0.707106769 : f32
    %8 = vector.broadcast %cst_6 : f32 to vector<32x256xf32>
    %9 = arith.mulf %5, %8 : vector<32x256xf32>
    %10 = math.erf %9 : vector<32x256xf32>
    %cst_7 = arith.constant 1.000000e+00 : f32
    %11 = vector.broadcast %cst_7 : f32 to vector<32x256xf32>
    %12 = arith.addf %11, %10 : vector<32x256xf32>
    %13 = arith.mulf %7, %12 : vector<32x256xf32>
    %14 = arith.truncf %13 : vector<32x256xf32> to vector<32x256xbf16>
    %c0_8 = arith.constant 0 : index
    %c0_9 = arith.constant 0 : index
    %15 = vector.load %arg4[%c0_8, %c0_9] : memref<256x128xbf16, #tpu.memory_space<vmem>>, vector<256x128xbf16>
    %cst_10 = arith.constant dense<0.000000e+00> : vector<32x128xf32>
    %16 = tpu.matmul %14, %15, %cst_10 {dimension_numbers = #tpu.dot_dimension_numbers<[1], [0], [0], [1], [0, 0, 1, 1], [], []>} : vector<32x256xbf16>, vector<256x128xbf16>, vector<32x128xf32> -> vector<32x128xf32>
    %c0_11 = arith.constant 0 : index
    %c0_12 = arith.constant 0 : index
    %17 = vector.load %arg5[%c0_11, %c0_12] : memref<1x128xf32, #tpu.memory_space<vmem>>, vector<1x128xf32>
    %18 = vector.broadcast %17 : vector<1x128xf32> to vector<32x128xf32>
    %19 = arith.addf %16, %18 : vector<32x128xf32>
    %20 = arith.extf %0 : vector<32x128xbf16> to vector<32x128xf32>
    %21 = arith.addf %19, %20 : vector<32x128xf32>
    %cst_13 = arith.constant dense<0.000000e+00> : vector<32xf32>
    %22 = vector.multi_reduction <add>, %21, %cst_13 [1] : vector<32x128xf32> to vector<32xf32>
    %23 = vector.shape_cast %22 : vector<32xf32> to vector<32x1xf32>
    %cst_14 = arith.constant 1.280000e+02 : f32
    %24 = vector.broadcast %cst_14 : f32 to vector<32x1xf32>
    %25 = arith.divf %23, %24 : vector<32x1xf32>
    %26 = vector.broadcast %25 : vector<32x1xf32> to vector<32x128xf32>
    %27 = arith.subf %21, %26 : vector<32x128xf32>
    %28 = vector.broadcast %25 : vector<32x1xf32> to vector<32x128xf32>
    %29 = arith.subf %21, %28 : vector<32x128xf32>
    %30 = arith.mulf %27, %29 : vector<32x128xf32>
    %cst_15 = arith.constant dense<0.000000e+00> : vector<32xf32>
    %31 = vector.multi_reduction <add>, %30, %cst_15 [1] : vector<32x128xf32> to vector<32xf32>
    %32 = vector.shape_cast %31 : vector<32xf32> to vector<32x1xf32>
    %cst_16 = arith.constant 1.280000e+02 : f32
    %33 = vector.broadcast %cst_16 : f32 to vector<32x1xf32>
    %34 = arith.divf %32, %33 : vector<32x1xf32>
    %35 = vector.broadcast %25 : vector<32x1xf32> to vector<32x128xf32>
    %36 = arith.subf %21, %35 : vector<32x128xf32>
    %cst_17 = arith.constant 9.99999974E-6 : f32
    %37 = vector.broadcast %cst_17 : f32 to vector<32x1xf32>
    %38 = arith.addf %34, %37 : vector<32x1xf32>
    %39 = math.rsqrt %38 : vector<32x1xf32>
    %40 = vector.broadcast %39 : vector<32x1xf32> to vector<32x128xf32>
    %41 = arith.mulf %36, %40 : vector<32x128xf32>
    %c0_18 = arith.constant 0 : index
    %c0_19 = arith.constant 0 : index
    %42 = vector.load %arg6[%c0_18, %c0_19] : memref<1x128xf32, #tpu.memory_space<vmem>>, vector<1x128xf32>
    %43 = vector.broadcast %42 : vector<1x128xf32> to vector<32x128xf32>
    %44 = arith.mulf %41, %43 : vector<32x128xf32>
    %c0_20 = arith.constant 0 : index
    %c0_21 = arith.constant 0 : index
    %45 = vector.load %arg7[%c0_20, %c0_21] : memref<1x128xf32, #tpu.memory_space<vmem>>, vector<1x128xf32>
    %46 = vector.broadcast %45 : vector<1x128xf32> to vector<32x128xf32>
    %47 = arith.addf %44, %46 : vector<32x128xf32>
    %48 = arith.truncf %47 : vector<32x128xf32> to vector<32x128xbf16>
    %c0_22 = arith.constant 0 : index
    %c0_23 = arith.constant 0 : index
    %49 = vector.load %arg8[%c0_22, %c0_23] : memref<32x128xbf16, #tpu.memory_space<vmem>>, vector<32x128xbf16>
    tpu.vector_store %arg8[%c0_22, %c0_23], %48 {strides = array<i32>} : memref<32x128xbf16, #tpu.memory_space<vmem>>, vector<32x128xbf16>,
    return
  }
  func.func @transform_0(%arg0: i32) -> (i32, i32) {
    %c0_i32 = arith.constant 0 : i32
    %c0_i32_0 = arith.constant 0 : i32
    return %arg0, %c0_i32 : i32, i32
  }
  func.func @transform_1(%arg0: i32) -> (i32, i32) {
    %c0_i32 = arith.constant 0 : i32
    %c0_i32_0 = arith.constant 0 : i32
    %c0_i32_1 = arith.constant 0 : i32
    return %c0_i32, %c0_i32_0 : i32, i32
  }
  func.func @transform_2(%arg0: i32) -> (i32, i32) {
    %c0_i32 = arith.constant 0 : i32
    %c0_i32_0 = arith.constant 0 : i32
    %c0_i32_1 = arith.constant 0 : i32
    return %c0_i32, %c0_i32_0 : i32, i32
  }
  func.func @transform_3(%arg0: i32) -> (i32, i32) {
    %c0_i32 = arith.constant 0 : i32
    %c0_i32_0 = arith.constant 0 : i32
    %c0_i32_1 = arith.constant 0 : i32
    return %c0_i32, %c0_i32_0 : i32, i32
  }
  func.func @transform_4(%arg0: i32) -> (i32, i32) {
    %c0_i32 = arith.constant 0 : i32
    %c0_i32_0 = arith.constant 0 : i32
    %c0_i32_1 = arith.constant 0 : i32
    return %c0_i32, %c0_i32_0 : i32, i32
  }
  func.func @transform_5(%arg0: i32) -> (i32, i32) {
    %c0_i32 = arith.constant 0 : i32
    %c0_i32_0 = arith.constant 0 : i32
    %c0_i32_1 = arith.constant 0 : i32
    return %c0_i32, %c0_i32_0 : i32, i32
  }
  func.func @transform_6(%arg0: i32) -> (i32, i32) {
    %c0_i32 = arith.constant 0 : i32
    %c0_i32_0 = arith.constant 0 : i32
    %c0_i32_1 = arith.constant 0 : i32
    return %c0_i32, %c0_i32_0 : i32, i32
  }
  func.func @transform_7(%arg0: i32) -> (i32, i32) {
    %c0_i32 = arith.constant 0 : i32
    %c0_i32_0 = arith.constant 0 : i32
    return %arg0, %c0_i32 : i32, i32
  }
}

</mosaic_0001>

<bundles_post_ra>
// kernel: xlmr_extract_features.9
= control target key start
LH: loop header
LB: loop body
LE: loop exit
PB: predicated region body
PF: predicated region fallthrough
CT: control target
= control target key end

     0   :  { %s189_s0 = inlined_call_operand.vmem [shape: bf16[32,128], index: 0, kind: input, shape index: {}]   ;;  %s190_s1 = inlined_call_operand.vmem [shape: f32[1,128], index: 1, kind: input, shape index: {}]   ;;  %s191_s2 = inlined_call_operand.vmem [shape: f32[1,128], index: 2, kind: input, shape index: {}]   ;;  %s192_s3 = inlined_call_operand.vmem [shape: bf16[32,128], index: 3, kind: output, shape index: {}]  }
   0x1   :  { %v124_v0 = vld [vmem:[%s189_s0] sm:$0xff]   ;;  %v141_v1 = vld [vmem:[%s189_s0 + $0x8] sm:$0xff]  }
   0x2   :  { %v125_v2 = vunpack.c.l.bf16 %v124_v0  ;;  %v129_v3 = vunpack.c.l.bf16 %v141_v1  ;;  %v126_v4 = vunpack.c.h.bf16 %v124_v0  ;;  %v130_v5 = vunpack.c.h.bf16 %v141_v1  ;;  %v113_v36 = vld [vmem:[%s190_s1] ss:$0 sm:$0xff] }
   0x3   :  { %v114_v41 = vld [vmem:[%s191_s2] ss:$0 sm:$0xff] }
   0x4   :  { %22 = vadd.xlane.f32.xlu0 %v125_v2  ;;  %26 = vadd.xlane.f32.xlu1 %v129_v3 }
   0x8   :  { %24 = vadd.xlane.f32.xlu0 %v126_v4  ;;  %28 = vadd.xlane.f32.xlu1 %v130_v5 }
  0x91   :  { %v23_v6 = vpop.xlane.xlu0 %22  ;;  %v27_v7 = vpop.xlane.xlu1 %26 }
  0x92   :  { %v31_v8 = vmul.f32 0.0078125, %v23_v6  ;;  %v33_v9 = vmul.f32 0.0078125, %v27_v7 }
  0x94   :  { %v35_v10 = vsub.f32 %v125_v2, %v31_v8  ;;  %v37_v11 = vsub.f32 %v129_v3, %v33_v9 }
  0x95   :  { %v25_v12 = vpop.xlane.xlu0 %24  ;;  %v29_v13 = vpop.xlane.xlu1 %28 }
  0x96   :  { %v32_v14 = vmul.f32 0.0078125, %v25_v12  ;;  %v39_v15 = vmul.f32 %v35_v10, %v35_v10  ;;  %v34_v16 = vmul.f32 0.0078125, %v29_v13  ;;  %v41_v19 = vmul.f32 %v37_v11, %v37_v11 }
  0x98   :  { %v36_v17 = vsub.f32 %v126_v4, %v32_v14  ;;  %43 = vadd.xlane.f32.xlu0 %v39_v15  ;;  %v38_v18 = vsub.f32 %v130_v5, %v34_v16 }
  0x9a   :  { %v40_v20 = vmul.f32 %v36_v17, %v36_v17  ;;  %v42_v21 = vmul.f32 %v38_v18, %v38_v18 }
  0x9c   :  { %47 = vadd.xlane.f32.xlu0 %v41_v19  ;;  %45 = vadd.xlane.f32.xlu1 %v40_v20 }
  0xa0   :  { %49 = vadd.xlane.f32.xlu1 %v42_v21 }
 0x125   :  { %v44_v22 = vpop.xlane.xlu0 %43 }
 0x126   :  { %v51_v23 = vmul.f32 0.0078125, %v44_v22 }
 0x128   :  { %v55_v24 = vadd.f32 1e-05, %v51_v23 }
 0x129   :  { %v46_v25 = vpop.xlane.xlu1 %45  ;;  %v48_v26 = vpop.xlane.xlu0 %47 }
 0x12a   :  { %143 = vrsqrt.f32 %v55_v24  ;;  %v52_v27 = vmul.f32 0.0078125, %v46_v25  ;;  %v53_v28 = vmul.f32 0.0078125, %v48_v26 }
 0x12c   :  { %v56_v29 = vadd.f32 1e-05, %v52_v27  ;;  %v57_v30 = vadd.f32 1e-05, %v53_v28 }
 0x12d   :  { %v50_v31 = vpop.xlane.xlu1 %49 }
 0x12e   :  { %145 = vrsqrt.f32 %v56_v29  ;;  %v54_v32 = vmul.f32 0.0078125, %v50_v31 }
 0x12f   :  { %147 = vrsqrt.f32 %v57_v30 }
 0x130   :  { %v58_v33 = vadd.f32 1e-05, %v54_v32 }
 0x132   :  { %149 = vrsqrt.f32 %v58_v33 }
 0x134   :  { %v144_v34 = vpop.eup %143 }
 0x135   :  { %v63_v35 = vmul.f32 %v144_v34, %v35_v10 }
 0x137   :  { %v74_v39 = vmul.f32 %v113_v36, %v63_v35 }
 0x138   :  { %v146_v37 = vpop.eup %145 }
 0x139   :  { %v148_v38 = vpop.eup %147  ;;  %v64_v40 = vmul.f32 %v146_v37, %v36_v17  ;;  %v85_v45 = vadd.f32 %v114_v41, %v74_v39 }
 0x13a   :  { %v65_v42 = vmul.f32 %v148_v38, %v37_v11 }
 0x13b   :  { %v75_v43 = vmul.f32 %v113_v36, %v64_v40 }
 0x13c   :  { %v150_v44 = vpop.eup %149  ;;  %v76_v47 = vmul.f32 %v113_v36, %v65_v42 }
 0x13d   :  { %v86_v46 = vadd.f32 %v114_v41, %v75_v43  ;;  %v66_v48 = vmul.f32 %v150_v44, %v38_v18 }
 0x13e   :  { %v87_v51 = vadd.f32 %v114_v41, %v76_v47 }
 0x13f   :  { %v134_v49 = vpack.c.bf16 %v86_v46, %v85_v45  ;;  %v77_v50 = vmul.f32 %v113_v36, %v66_v48 }
 0x141   :  { %135 = vst [vmem:[%s192_s3] sm:$0xff] %v134_v49   ;;  %v88_v52 = vadd.f32 %v114_v41, %v77_v50 }
 0x143   :  { %v139_v53 = vpack.c.bf16 %v88_v52, %v87_v51 }
 0x145   :  { %142 = vst [vmem:[%s192_s3 + $0x8] sm:$0xff] %v139_v53  }

// kernel: xlmr_extract_features.12
= control target key start
LH: loop header
LB: loop body
LE: loop exit
PB: predicated region body
PF: predicated region fallthrough
CT: control target
= control target key end

     0   :  { %s438_s1 = inlined_call_operand.vmem [shape: bf16[128,128], index: 1, kind: input, shape index: {}]   ;;  %s439_s0 = inlined_call_operand.vmem [shape: bf16[32,128], index: 0, kind: input, shape index: {}]   ;;  %s440_s3 = inlined_call_operand.vmem [shape: bf16[32,128], index: 3, kind: input, shape index: {}]   ;;  %s441_s2 = inlined_call_operand.vmem [shape: f32[1,128], index: 2, kind: input, shape index: {}]   ;;  %s442_s4 = inlined_call_operand.vmem [shape: f32[1,128], index: 4, kind: input, shape index: {}]   ;;  %s443_s5 = inlined_call_operand.vmem [shape: f32[1,128], index: 5, kind: input, shape index: {}]   ;;  %s444_s6 = inlined_call_operand.vmem [shape: bf16[32,128], index: 6, kind: output, shape index: {}]  }
   0x1   :  { %v334_v0 = vld [vmem:[%s438_s1] sm:$0xff]   ;;  %v335_v1 = vld [vmem:[%s438_s1 + $0x8] sm:$0xff]   ;;  %v336_v2 = vld [vmem:[%s438_s1 + $0x10] sm:$0xff]  }
   0x2   :  { %314 = vmatprep.subr.bf16.mxu0 %v334_v0  ;;  %v337_v3 = vld [vmem:[%s438_s1 + $0x18] sm:$0xff]   ;;  %v342_v4 = vld [vmem:[%s439_s0] sm:$0xff]   ;;  %v339_v6 = vld [vmem:[%s438_s1 + $0x28] sm:$0xff]  }
   0x3   :  { %315 = vmatpush3.bf16.msra.mxu0 %v334_v0  ;;  %330 = vmatprep.mubr.bf16.mxu0 %v342_v4  ;;  %v338_v5 = vld [vmem:[%s438_s1 + $0x20] sm:$0xff]   ;;  %v340_v7 = vld [vmem:[%s438_s1 + $0x30] sm:$0xff]   ;;  %v341_v8 = vld [vmem:[%s438_s1 + $0x38] sm:$0xff]  }
   0x4   :  { %316 = vmatprep.subr.bf16.mxu0 %v335_v1  ;;  %v343_v9 = vld [vmem:[%s439_s0 + $0x8] sm:$0xff]   ;;  %v285_v11 = vld [vmem:[%s440_s3] sm:$0xff]  }
   0x5   :  { %v302_v10 = vld [vmem:[%s440_s3 + $0x8] sm:$0xff]   ;;  %v263_v12 = vld [vmem:[%s441_s2] ss:$0 sm:$0xff]  ;;  %v286_v15 = vunpack.c.l.bf16 %v285_v11  ;;  %v287_v26 = vunpack.c.h.bf16 %v285_v11 }
   0x6   :  { %v290_v13 = vunpack.c.l.bf16 %v302_v10  ;;  %v291_v23 = vunpack.c.h.bf16 %v302_v10  ;;  %v274_v59 = vld [vmem:[%s442_s4] ss:$0 sm:$0xff] }
   0x7   :  { %317 = vmatpush3.bf16.msra.mxu0 %v335_v1  ;;  %v275_v0 = vld [vmem:[%s443_s5] ss:$0 sm:$0xff] }
   0x8   :  { %318 = vmatprep.subr.bf16.mxu0 %v336_v2 }
   0xb   :  { %319 = vmatpush3.bf16.msra.mxu0 %v336_v2 }
   0xc   :  { %320 = vmatprep.subr.bf16.mxu0 %v337_v3 }
   0xf   :  { %321 = vmatpush3.bf16.msra.mxu0 %v337_v3 }
  0x10   :  { %322 = vmatprep.subr.bf16.mxu0 %v338_v5 }
  0x13   :  { %323 = vmatpush3.bf16.msra.mxu0 %v338_v5 }
  0x14   :  { %324 = vmatprep.subr.bf16.mxu0 %v339_v6 }
  0x17   :  { %325 = vmatpush3.bf16.msra.mxu0 %v339_v6 }
  0x18   :  { %326 = vmatprep.subr.bf16.mxu0 %v340_v7 }
  0x1b   :  { %327 = vmatpush3.bf16.msra.mxu0 %v340_v7 }
  0x1c   :  { %328 = vmatprep.subr.bf16.mxu0 %v341_v8 }
  0x1f   :  { %329 = vmatpush3.bf16.msra.mxu0 %v341_v8 }
  0x22   :  { %331 = vmatmul.mubr.bf16.vlgmr.msra.gmra.mrb[0].mxu0 %v343_v9 }
  0xf5   :  { %v332_v14 = vpop.f32.mrb[0].mxu0 }
  0xf6   :  { %v154_v16 = vadd.f32 %v332_v14, %v263_v12  ;;  %v145_v17 = vpop.f32.mrb[1].mxu0 }
  0xf7   :  { %v146_v18 = vadd.f32 %v263_v12, %v145_v17  ;;  %v333_v19 = vpop.f32.mrb[2].mxu0 }
  0xf8   :  { %v157_v20 = vadd.f32 %v333_v19, %v263_v12  ;;  %v148_v21 = vpop.f32.mrb[3].mxu0  ;;  %v170_v22 = vadd.f32 %v290_v13, %v154_v16 }
  0xf9   :  { %v149_v24 = vadd.f32 %v263_v12, %v148_v21  ;;  %v168_v25 = vadd.f32 %v286_v15, %v146_v18 }
  0xfa   :  { %176 = vadd.xlane.f32.xlu1 %v170_v22  ;;  %v171_v27 = vadd.f32 %v291_v23, %v157_v20 }
  0xfb   :  { %172 = vadd.xlane.f32.xlu0 %v168_v25  ;;  %v169_v28 = vadd.f32 %v287_v26, %v149_v24 }
  0xfe   :  { %178 = vadd.xlane.f32.xlu1 %v171_v27 }
  0xff   :  { %174 = vadd.xlane.f32.xlu0 %v169_v28 }
 0x187   :  { %v177_v29 = vpop.xlane.xlu1 %176 }
 0x188   :  { %v173_v30 = vpop.xlane.xlu0 %172  ;;  %v183_v31 = vmul.f32 0.0078125, %v177_v29 }
 0x189   :  { %v181_v32 = vmul.f32 0.0078125, %v173_v30 }
 0x18a   :  { %v187_v36 = vsub.f32 %v170_v22, %v183_v31 }
 0x18b   :  { %v185_v33 = vsub.f32 %v168_v25, %v181_v32  ;;  %v179_v34 = vpop.xlane.xlu1 %178 }
 0x18c   :  { %v175_v35 = vpop.xlane.xlu0 %174  ;;  %v184_v37 = vmul.f32 0.0078125, %v179_v34  ;;  %v191_v42 = vmul.f32 %v187_v36, %v187_v36 }
 0x18d   :  { %v182_v38 = vmul.f32 0.0078125, %v175_v35  ;;  %v189_v39 = vmul.f32 %v185_v33, %v185_v33 }
 0x18e   :  { %v188_v41 = vsub.f32 %v171_v27, %v184_v37 }
 0x18f   :  { %v186_v40 = vsub.f32 %v169_v28, %v182_v38  ;;  %193 = vadd.xlane.f32.xlu0 %v189_v39 }
 0x190   :  { %v192_v44 = vmul.f32 %v188_v41, %v188_v41 }
 0x191   :  { %v190_v43 = vmul.f32 %v186_v40, %v186_v40 }
 0x193   :  { %197 = vadd.xlane.f32.xlu0 %v191_v42  ;;  %195 = vadd.xlane.f32.xlu1 %v190_v43 }
 0x197   :  { %199 = vadd.xlane.f32.xlu1 %v192_v44 }
 0x21c   :  { %v194_v45 = vpop.xlane.xlu0 %193 }
 0x21d   :  { %v201_v46 = vmul.f32 0.0078125, %v194_v45 }
 0x21f   :  { %v205_v47 = vadd.f32 1e-05, %v201_v46 }
 0x220   :  { %v196_v48 = vpop.xlane.xlu1 %195  ;;  %v198_v49 = vpop.xlane.xlu0 %197 }
 0x221   :  { %344 = vrsqrt.f32 %v205_v47  ;;  %v202_v50 = vmul.f32 0.0078125, %v196_v48  ;;  %v203_v51 = vmul.f32 0.0078125, %v198_v49 }
 0x223   :  { %v206_v52 = vadd.f32 1e-05, %v202_v50  ;;  %v207_v53 = vadd.f32 1e-05, %v203_v51 }
 0x224   :  { %v200_v54 = vpop.xlane.xlu1 %199 }
 0x225   :  { %346 = vrsqrt.f32 %v206_v52  ;;  %v204_v55 = vmul.f32 0.0078125, %v200_v54 }
 0x226   :  { %348 = vrsqrt.f32 %v207_v53 }
 0x227   :  { %v208_v56 = vadd.f32 1e-05, %v204_v55 }
 0x229   :  { %350 = vrsqrt.f32 %v208_v56 }
 0x22b   :  { %v345_v57 = vpop.eup %344 }
 0x22c   :  { %v213_v58 = vmul.f32 %v345_v57, %v185_v33 }
 0x22e   :  { %v224_v62 = vmul.f32 %v274_v59, %v213_v58 }
 0x22f   :  { %v347_v60 = vpop.eup %346 }
 0x230   :  { %v349_v61 = vpop.eup %348  ;;  %v214_v63 = vmul.f32 %v347_v60, %v186_v40  ;;  %v235_v4 = vadd.f32 %v275_v0, %v224_v62 }
 0x231   :  { %v215_v1 = vmul.f32 %v349_v61, %v187_v36 }
 0x232   :  { %v225_v2 = vmul.f32 %v274_v59, %v214_v63 }
 0x233   :  { %v351_v3 = vpop.eup %350  ;;  %v226_v6 = vmul.f32 %v274_v59, %v215_v1 }
 0x234   :  { %v236_v5 = vadd.f32 %v275_v0, %v225_v2  ;;  %v216_v7 = vmul.f32 %v351_v3, %v188_v41 }
 0x235   :  { %v237_v10 = vadd.f32 %v275_v0, %v226_v6 }
 0x236   :  { %v295_v8 = vpack.c.bf16 %v236_v5, %v235_v4  ;;  %v227_v9 = vmul.f32 %v274_v59, %v216_v7 }
 0x238   :  { %296 = vst [vmem:[%s444_s6] sm:$0xff] %v295_v8   ;;  %v238_v11 = vadd.f32 %v275_v0, %v227_v9 }
 0x23a   :  { %v300_v12 = vpack.c.bf16 %v238_v11, %v237_v10 }
 0x23c   :  { %303 = vst [vmem:[%s444_s6 + $0x8] sm:$0xff] %v300_v12  }

// kernel: xlmr_extract_features.10
= control target key start
LH: loop header
LB: loop body
LE: loop exit
PB: predicated region body
PF: predicated region fallthrough
CT: control target
= control target key end

     0   :  { %v469_v1 = vmov 0   ;;  %v53_v27 = vlaneseq  ;;  %s595_s1 = inlined_call_operand.vmem [shape: bf16[128,384], index: 1, kind: input, shape index: {}]   ;;  %s596_s0 = inlined_call_operand.vmem [shape: bf16[32,128], index: 0, kind: input, shape index: {}]   ;;  %s597_s2 = inlined_call_operand.vmem [shape: f32[1,384], index: 2, kind: input, shape index: {}]   ;;  %s598_s3 = inlined_call_operand.vmem [shape: bf16[32,384], index: 3, kind: output, shape index: {}]  }
   0x1   :  { %v435_v0 = vld [vmem:[%s595_s1 + $0x4] ss:$12 sps:$4 sm:$0xff]   ;;  %240 = vmatprep.mubr.bf16.mxu0 %v469_v1  ;;  %v437_v2 = vld [vmem:[%s595_s1] ss:$12 sps:$4 sm:$0xff]   ;;  %v438_v3 = vld [vmem:[%s595_s1 + $0x1c] ss:$12 sps:$4 sm:$0xff]  }
   0x2   :  { %208 = vmatprep.subr.bf16.mxu0 %v435_v0  ;;  %v440_v4 = vld [vmem:[%s595_s1 + $0x18] ss:$12 sps:$4 sm:$0xff]   ;;  %v441_v5 = vld [vmem:[%s595_s1 + $0x8] ss:$12 sps:$4 sm:$0xff]   ;;  %v445_v7 = vld [vmem:[%s595_s1 + $0x20] ss:$12 sps:$4 sm:$0xff]  }
   0x3   :  { %209 = vmatpush1.bf16.msra.mxu0 %v437_v2  ;;  %v442_v6 = vld [vmem:[%s595_s1 + $0x34] ss:$12 sps:$4 sm:$0xff]   ;;  %414 = vmatprep.subr.bf16.mxu1 %v441_v5  ;;  %v444_v8 = vld [vmem:[%s595_s1 + $0x30] ss:$12 sps:$4 sm:$0xff]   ;;  %v446_v9 = vld [vmem:[%s595_s1 + $0x4c] ss:$12 sps:$4 sm:$0xff]  }
   0x4   :  { %210 = vmatprep.subr.bf16.mxu0 %v438_v3  ;;  %415 = vmatpush3.bf16.msra.mxu1 %v441_v5  ;;  %v449_v10 = vld [vmem:[%s595_s1 + $0x38] ss:$12 sps:$4 sm:$0xff]   ;;  %v448_v11 = vld [vmem:[%s595_s1 + $0x48] ss:$12 sps:$4 sm:$0xff]   ;;  %v453_v12 = vld [vmem:[%s595_s1 + $0x50] ss:$12 sps:$4 sm:$0xff]  }
   0x5   :  { %416 = vmatprep.subr.bf16.mxu1 %v445_v7  ;;  %v450_v13 = vld [vmem:[%s595_s1 + $0x64] ss:$12 sps:$4 sm:$0xff]   ;;  %v452_v14 = vld [vmem:[%s595_s1 + $0x60] ss:$12 sps:$4 sm:$0xff]   ;;  %v457_v15 = vld [vmem:[%s595_s1 + $0x68] ss:$12 sps:$4 sm:$0xff]  }
   0x6   :  { %v454_v16 = vld [vmem:[%s595_s1 + $0x7c] ss:$12 sps:$4 sm:$0xff]   ;;  %v456_v17 = vld [vmem:[%s595_s1 + $0x78] ss:$12 sps:$4 sm:$0xff]   ;;  %v461_v19 = vld [vmem:[%s595_s1 + $0x80] ss:$12 sps:$4 sm:$0xff]  }
   0x7   :  { %211 = vmatpush1.bf16.msra.mxu0 %v440_v4  ;;  %v466_v18 = vld [vmem:[%s596_s0] sm:$0xff]   ;;  %v460_v21 = vld [vmem:[%s595_s1 + $0x90] ss:$12 sps:$4 sm:$0xff]   ;;  %v462_v23 = vld [vmem:[%s595_s1 + $0xac] ss:$12 sps:$4 sm:$0xff]   ;;  %v54_v28 = vshrl.u32 %v53_v27, 7 }
   0x8   :  { %212 = vmatprep.subr.bf16.mxu0 %v442_v6  ;;  %417 = vmatpush3.bf16.msra.mxu1 %v445_v7  ;;  %v458_v20 = vld [vmem:[%s595_s1 + $0x94] ss:$12 sps:$4 sm:$0xff]   ;;  %v465_v22 = vld [vmem:[%s595_s1 + $0x98] ss:$12 sps:$4 sm:$0xff]   ;;  %v467_v25 = vld [vmem:[%s595_s1 + $0xb0] ss:$12 sps:$4 sm:$0xff]  }
   0x9   :  { %418 = vmatprep.subr.bf16.mxu1 %v449_v10  ;;  %430 = vmatprep.mubr.bf16.mxu1 %v466_v18  ;;  %v464_v24 = vld [vmem:[%s595_s1 + $0xa8] ss:$12 sps:$4 sm:$0xff]   ;;  %v55_v29 = vsub.s32 0, %v54_v28  ;;  %v51_v30 = vld [vmem:[%s597_s2] sm:$0x7]  ;;  %v59_v31 = vsub.s32 1, %v54_v28 }
   0xa   :  { %v468_v26 = vld [vmem:[%s596_s0 + $0x8] sm:$0xff]   ;;  %v63_v32 = vsub.s32 2, %v54_v28 }
   0xb   :  { %213 = vmatpush1.bf16.msra.mxu0 %v444_v8  ;;  %v56_v33 = vrot.slane %v51_v30, %v55_v29  ;;  %v60_v34 = vrot.slane %v51_v30, %v59_v31 }
   0xc   :  { %214 = vmatprep.subr.bf16.mxu0 %v446_v9  ;;  %419 = vmatpush3.bf16.msra.mxu1 %v449_v10  ;;  %v64_v36 = vrot.slane %v51_v30, %v63_v32 }
   0xd   :  { %420 = vmatprep.subr.bf16.mxu1 %v453_v12 }
   0xf   :  { %215 = vmatpush1.bf16.msra.mxu0 %v448_v11 }
  0x10   :  { %216 = vmatprep.subr.bf16.mxu0 %v450_v13  ;;  %421 = vmatpush3.bf16.msra.mxu1 %v453_v12 }
  0x11   :  { %422 = vmatprep.subr.bf16.mxu1 %v457_v15 }
  0x13   :  { %217 = vmatpush1.bf16.msra.mxu0 %v452_v14 }
  0x14   :  { %218 = vmatprep.subr.bf16.mxu0 %v454_v16  ;;  %423 = vmatpush3.bf16.msra.mxu1 %v457_v15 }
  0x15   :  { %424 = vmatprep.subr.bf16.mxu1 %v461_v19 }
  0x17   :  { %219 = vmatpush1.bf16.msra.mxu0 %v456_v17 }
  0x18   :  { %220 = vmatprep.subr.bf16.mxu0 %v458_v20  ;;  %425 = vmatpush3.bf16.msra.mxu1 %v461_v19 }
  0x19   :  { %426 = vmatprep.subr.bf16.mxu1 %v465_v22 }
  0x1b   :  { %221 = vmatpush1.bf16.msra.mxu0 %v460_v21 }
  0x1c   :  { %222 = vmatprep.subr.bf16.mxu0 %v462_v23  ;;  %427 = vmatpush3.bf16.msra.mxu1 %v465_v22 }
  0x1d   :  { %428 = vmatprep.subr.bf16.mxu1 %v467_v25 }
  0x1f   :  { %223 = vmatpush1.bf16.msra.mxu0 %v464_v24 }
  0x20   :  { %429 = vmatpush3.bf16.msra.mxu1 %v467_v25 }
  0x22   :  { %241 = vmatmul.mubr.bf16.vlgmr.msra.gmra.mrb[0].mxu0 %v466_v18 }
  0x23   :  { %250 = vmatprep.mubr.bf16.mxu0 %v469_v1  ;;  %431 = vmatmul.mubr.bf16.vlgmr.msra.gmra.mrb[0].mxu1 %v468_v26 }
  0x2a   :  { %251 = vmatmul.mubr.bf16.gmra.mrb[4].mxu0 %v468_v26 }
  0xf5   :  { %v242_v35 = vpop.f32.mrb[0].mxu0 }
  0xf6   :  { %v243_v37 = vadd.f32 %v242_v35, %v56_v33  ;;  %v244_v38 = vpop.f32.mrb[1].mxu0  ;;  %v432_v43 = vpop.f32.mrb[0].mxu1 }
  0xf7   :  { %v245_v39 = vadd.f32 %v244_v38, %v60_v34  ;;  %v246_v40 = vpop.f32.mrb[2].mxu0  ;;  %v304_v46 = vadd.f32 %v432_v43, %v64_v36  ;;  %v295_v47 = vpop.f32.mrb[1].mxu1 }
  0xf8   :  { %v247_v41 = vadd.f32 %v246_v40, %v56_v33  ;;  %v248_v42 = vpop.f32.mrb[3].mxu0  ;;  %v296_v48 = vadd.f32 %v295_v47, %v64_v36  ;;  %v433_v49 = vpop.f32.mrb[2].mxu1 }
  0xf9   :  { %v396_v44 = vpack.c.bf16 %v245_v39, %v243_v37  ;;  %v249_v45 = vadd.f32 %v248_v42, %v60_v34  ;;  %v401_v51 = vpack.c.bf16 %v304_v46, %v304_v46  ;;  %v307_v52 = vadd.f32 %v433_v49, %v64_v36  ;;  %v298_v53 = vpop.f32.mrb[3].mxu1 }
  0xfa   :  { %v397_v54 = vpack.c.bf16 %v296_v48, %v296_v48  ;;  %v299_v55 = vadd.f32 %v298_v53, %v64_v36 }
  0xfb   :  { %350 = vst [vmem:[%s598_s3] sm:$0xff] %v396_v44  ;;  %v398_v50 = vpack.c.bf16 %v249_v45, %v247_v41  ;;  %355 = vst [vmem:[%s598_s3 + $0x20] sm:$0xf] %v401_v51  ;;  %v403_v56 = vpack.c.bf16 %v307_v52, %v307_v52 }
  0xfc   :  { %351 = vst [vmem:[%s598_s3 + $0x8] sm:$0xf] %v397_v54  ;;  %v399_v59 = vpack.c.bf16 %v299_v55, %v299_v55 }
  0xfd   :  { %352 = vst [vmem:[%s598_s3 + $0xc] sm:$0xff] %v398_v50  ;;  %v252_v57 = vpop.f32.mrb[4].mxu0  ;;  %357 = vst [vmem:[%s598_s3 + $0x2c] sm:$0xf] %v403_v56 }
  0xfe   :  { %v253_v58 = vadd.f32 %v252_v57, %v56_v33  ;;  %v254_v60 = vpop.f32.mrb[5].mxu0  ;;  %353 = vst [vmem:[%s598_s3 + $0x14] sm:$0xf] %v399_v59 }
  0xff   :  { %v255_v61 = vadd.f32 %v254_v60, %v60_v34  ;;  %v256_v62 = vpop.f32.mrb[6].mxu0 }
 0x100   :  { %v257_v63 = vadd.f32 %v256_v62, %v56_v33  ;;  %v258_v0 = vpop.f32.mrb[7].mxu0 }
 0x101   :  { %v400_v1 = vpack.c.bf16 %v255_v61, %v253_v58  ;;  %v259_v2 = vadd.f32 %v258_v0, %v60_v34 }
 0x103   :  { %354 = vst [vmem:[%s598_s3 + $0x18] sm:$0xff] %v400_v1  ;;  %v402_v3 = vpack.c.bf16 %v259_v2, %v257_v63 }
 0x105   :  { %356 = vst [vmem:[%s598_s3 + $0x24] sm:$0xff] %v402_v3 }

// kernel: xlmr_extract_features.11
= control target key start
LH: loop header
LB: loop body
LE: loop exit
PB: predicated region body
PF: predicated region fallthrough
CT: control target
= control target key end

     0   :  { %s1322_s12 = smov 0   ;;  %s1324_s13 = smov 0   ;;  %s1499_s0 = inlined_call_operand.vmem [shape: bf16[2,16,384], index: 0, kind: input, shape index: {}, may-alias: {0,1,2}]   ;;  %s1500_s1 = inlined_call_operand.vmem [shape: bf16[2,16,384], index: 1, kind: input, shape index: {}, may-alias: {0,1,2}]   ;;  %s1501_s2 = inlined_call_operand.vmem [shape: bf16[2,16,384], index: 2, kind: input, shape index: {}, may-alias: {0,1,2}]   ;;  %s1502_s3 = inlined_call_operand.vmem [shape: bf16[2,16,128], index: 3, kind: output, shape index: {}]  }
   0x1   :  { %s1326_s14 = smov 0   ;;  %s1328_s15 = smov 0  }
   0x2   :  { %s1330_s16 = smov 0  }
   0x3 LB: > { %s25_s17 = sadd.s32 1, %s1291_s15  ;;  %p41_p1 = scmp.ne.s32.totalorder %s1283_s13, %s1279_s12  ;;  %s1295_s16 = sphi %s1330_s16, %s13_s16   ;;  %s1291_s15 = sphi %s1328_s15, %s1507_s15   ;;  %s1287_s14 = sphi %s1326_s14, %s1506_s14   ;;  %s1283_s13 = sphi %s1324_s13, %s1505_s13   ;;  %s1279_s12 = sphi %s1322_s12, %s1504_s12  }
   0x4   : > { %p27_p0 = scmp.ge.s32.totalorder %s25_s17, 2  ;;  %p42_p2 = scmp.eq.s32.totalorder %s1295_s16, 0 }
   0x5   : > { %s34_s20 = sadd.s32 1, %s1283_s13  ;;  %p1057_p5 = scmp.ge.s32.totalorder %s1295_s16, 2 }
   0x6   : > { %s1509_s17 = smov (%p27_p0, %s25_s17), 0  ;;  %p1353_p3 = por %p42_p2, %p41_p1 }
   0x7   : > { %s29_s19 = ssub.s32 %s1291_s15, %s1509_s17  ;;  %147 = sbr.rel (%p1057_p5) target bundleno = 35 (0x23), region = 16 }
   0x8   : > { %p32_p4 = scmp.eq.s32.totalorder %s29_s19, 0 }
   0xa   : > { %s1361_s21 = scalar_select %p32_p4, %s1283_s13, %s34_s20  }
   0xe   : > { %150 = sbr.rel (!%p1353_p3) target bundleno = 21 (0x15), region = 20  ;;  %s152_s22 = sand.u32 (%p1353_p3), 1, %s1283_s13  }
   0xf   : > { %s1161_s23 = smul.u32 (%p1353_p3), 24, %s1291_s15  ;;  %s1058_s24 = sshll.u32 (%p1353_p3), %s152_s22, 3 }
  0x10   : > { %s154_s28 = scalar_lea.vmem (%p1353_p3), [#allocation2], %s1058_s24 }
  0x11   : > { %s160_s27 = scalar_lea.vmem (%p1353_p3), %s1499_s0, %s1161_s23 }
  0x12   : > { %v176_v0 = vld [vmem:[%s160_s27] sm:$0xf] (%p1353_p3)  ;;  %v178_v1 = vld [vmem:[%s160_s27 + $0xc] sm:$0xf] (%p1353_p3) }
  0x13   : > { %177 = vst [vmem:[%s154_s28] sm:$0xf] (%p1353_p3), %v176_v0  ;;  %179 = vst [vmem:[%s154_s28 + $0x4] sm:$0xf] (%p1353_p3), %v178_v1 }
  0x15 PF: > { %206 = sbr.rel (!%p1353_p3) target bundleno = 28 (0x1c), region = 61  ;;  %s208_s29 = sand.u32 (%p1353_p3), 1, %s1283_s13  }
  0x16   : > { %s1061_s30 = smul.u32 (%p1353_p3), 24, %s1291_s15  ;;  %s1060_s4 = sshll.u32 (%p1353_p3), %s208_s29, 3 }
  0x17   : > { %s210_s8 = scalar_lea.vmem (%p1353_p3), [#allocation3], %s1060_s4 }
  0x18   : > { %s965_s7 = scalar_lea.vmem (%p1353_p3), %s1500_s1, %s1061_s30 }
  0x19   : > { %v1062_v2 = vld [vmem:[%s965_s7 + $0x4] sm:$0xf] (%p1353_p3)  ;;  %v1063_v3 = vld [vmem:[%s965_s7 + $0x10] sm:$0xf] (%p1353_p3) }
  0x1a   : > { %231 = vst [vmem:[%s210_s8] sm:$0xf] (%p1353_p3), %v1062_v2  ;;  %233 = vst [vmem:[%s210_s8 + $0x4] sm:$0xf] (%p1353_p3), %v1063_v3 }
  0x1c PF: > { %260 = sbr.rel (!%p1353_p3) target bundleno = 35 (0x23), region = 102  ;;  %s262_s9 = sand.u32 (%p1353_p3), 1, %s1283_s13  }
  0x1d   : > { %s1065_s10 = smul.u32 (%p1353_p3), 24, %s1291_s15  ;;  %s1064_s11 = sshll.u32 (%p1353_p3), %s262_s9, 3 }
  0x1e   : > { %s264_s23 = scalar_lea.vmem (%p1353_p3), [#allocation4], %s1064_s11 }
  0x1f   : > { %s971_s22 = scalar_lea.vmem (%p1353_p3), %s1501_s2, %s1065_s10 }
  0x20   : > { %v1066_v4 = vld [vmem:[%s971_s22 + $0x8] sm:$0xf] (%p1353_p3)  ;;  %v1067_v5 = vld [vmem:[%s971_s22 + $0x14] sm:$0xf] (%p1353_p3) }
  0x21   : > { %285 = vst [vmem:[%s264_s23] sm:$0xf] (%p1353_p3), %v1066_v4  ;;  %287 = vst [vmem:[%s264_s23 + $0x4] sm:$0xf] (%p1353_p3), %v1067_v5 }
  0x23 PF: > { %p1068_p6 = scmp.ge.s32.totalorder %s1295_s16, 1  ;;  %p313_p7 = scmp.lt.s32.totalorder %s1295_s16, 3 }
  0x25   : > { %p314_p8 = pnand %p1068_p6, %p313_p7 }
  0x26   : > { %s320_s18 = sand.u32 (!%p314_p8), 1, %s1279_s12   ;;  %v1297_v6 = vmov (!%p314_p8), 0.0   ;;  %vm1298_vm0 = vmmov (!%p314_p8), 0   ;;  %vm397_vm1 = vcmask (!%p314_p8), 261120   ;;  %s1299_s26 = smov (!%p314_p8), 96   ;;  %vm445_vm2 = vcmask (!%p314_p8), 130048  }
  0x27   : > { %317 = sbr.rel (%p314_p8) target bundleno = 1210 (0x4ba), region = 143  ;;  %1113 = vmatprep.subr.bf16.mxu0 (!%p314_p8), %v1297_v6  ;;  %s1389_s24 = sshll.u32 (!%p314_p8), %s320_s18, 3  ;;  %1115 = vmatprep.mubr.msk.bf16.mxu0 (!%p314_p8), %vm1298_vm0, %v1297_v6  ;;  %vm908_vm3 = vcmask (!%p314_p8), 523264   ;;  %vm911_vm4 = vcmask (!%p314_p8), 785408  }
  0x28   : > { %1119 = vmatprep.subr.bf16.mxu1 (!%p314_p8), %v1297_v6  ;;  %1121 = vmatprep.mubr.msk.bf16.mxu1 (!%p314_p8), %vm1298_vm0, %v1297_v6  ;;  %s329_s25 = scalar_lea.vmem (!%p314_p8), [#allocation3], %s1389_s24  ;;  %s322_s12 = scalar_lea.vmem (!%p314_p8), [#allocation2], %s1389_s24 }
  0x29   : > { %v1222_v7 = vld [vmem:[%s329_s25] sm:$0xff] (!%p314_p8)   ;;  %v1223_v9 = vld [vmem:[%s322_s12] sm:$0xff] (!%p314_p8)   ;;  %s1300_s27 = smov (!%p314_p8), 64   ;;  %s1301_s28 = smov (!%p314_p8), 32  }
  0x2a   : > { %v402_v8 = vsel (!%p314_p8), %vm397_vm1, %v1222_v7, 0  ;;  %521 = vrot.lane.b32.xlu1 (!%p314_p8), %v1222_v7, %s1299_s26  ;;  %s336_s29 = scalar_lea.vmem (!%p314_p8), [#allocation4], %s1389_s24  ;;  %p371_p9 = scmp.lt.s32.totalorder (!%p314_p8), %s1287_s14, 1 }
  0x2b   : > { %1114 = vmatpush3.bf16.xpose.msra.mxu0 (!%p314_p8), %v402_v8  ;;  %v1411_v16 = vld [vmem:[%s336_s29] sm:$0xff] (!%p314_p8)  }
  0x2c   : > { %1131 = vmatprep.subr.bf16.mxu0 (!%p314_p8), %v1297_v6  ;;  %1120 = vmatpush3.bf16.msra.mxu1 (!%p314_p8), %v1411_v16 }
  0x2d   : > { %1125 = vmatprep.subr.bf16.mxu1 (!%p314_p8), %v1297_v6 }
  0x2e   : > { %519 = vrot.lane.b32.xlu1 %v1223_v9, %s1299_s26  ;;  %s1511_s14 = smov (!%p371_p9, %s1287_s14), 1 }
  0x2f   : > { %s1089_s30 = sshll.u32 %s1511_s14, 3 }
  0x30   : > { %s378_s6 = scalar_lea.vmem %s1502_s3, %s1089_s30 }
  0x32   : > { %1116 = vmatmul.mubr.msk.bf16.vlgmr.msra.gmra.mrb[0].mxu0 %vm397_vm1, %v1223_v9  ;;  %640 = vrot.lane.b32.xlu1 %v1223_v9, %s1300_s27 }
  0x33   : > { %1133 = vmatprep.mubr.msk.bf16.mxu0 %vm1298_vm0, %v1297_v6 }
  0x36   : > { %763 = vrot.lane.b32.xlu1 %v1222_v7, %s1301_s28 }
  0x3a   : > { %761 = vrot.lane.b32.xlu1 %v1223_v9, %s1301_s28 }
  0x9c   : > { %v522_v23 = vpop.permute.xlu1 %521 }
  0x9d   : > { %v527_v26 = vsel %vm397_vm1, %v522_v23, 0 }
  0xa0   : > { %v520_v28 = vpop.permute.xlu1 %519 }
  0xa4   : > { %v641_v30 = vpop.permute.xlu1 %640 }
  0xa8   : > { %v764_v32 = vpop.permute.xlu1 %763 }
  0xa9   : > { %v769_v33 = vsel %vm397_vm1, %v764_v32, 0 }
  0xac   : > { %v762_v34 = vpop.permute.xlu1 %761 }
 0x105   : > { %v438_v10 = vpop.f32.mrb[0].mxu0 }
 0x106   : > { %v1117_v11 = vpop.f32.mrb[1].mxu0  ;;  %v446_v12 = vsel %vm445_vm2, %v438_v10, -inf }
 0x107   : > { %447 = vmax.xlane.f32.xlu0 %v446_v12  ;;  %v441_v13 = vpop.f32.mrb[2].mxu0 }
 0x108   : > { %v1118_v14 = vpop.f32.mrb[3].mxu0  ;;  %v449_v15 = vsel %vm445_vm2, %v441_v13, -inf }
 0x10b   : > { %450 = vmax.xlane.f32.xlu0 %v449_v15 }
 0x121   : > { %642 = vrot.lane.b32.xlu0 %v1222_v7, %s1300_s27 }
 0x194   : > { %v448_v17 = vpop.xlane.xlu0 %447 }
 0x195   : > { %v452_v18 = vsub.f32 %v438_v10, %v448_v17 }
 0x197   : > { %v454_v19 = vmul.f32 1.442695, %v452_v18 }
 0x198   : > { %v451_v20 = vpop.xlane.xlu0 %450 }
 0x199   : > { %v453_v21 = vsub.f32 %v441_v13, %v451_v20  ;;  %1225 = vpow2.f32 %v454_v19 }
 0x19b   : > { %v456_v22 = vmul.f32 1.442695, %v453_v21 }
 0x19c   : > { %v643_v29 = vpop.permute.xlu0 %642 }
 0x19d   : > { %1227 = vpow2.f32 %v456_v22  ;;  %v648_v31 = vsel %vm397_vm1, %v643_v29, 0 }
 0x1a3   : > { %v1416_v24 = vpop.eup %1225 }
 0x1a4   : > { %v458_v23 = vsel %vm445_vm2, %v1416_v24, 0.0 }
 0x1a7   : > { %v1418_v25 = vpop.eup %1227 }
 0x1a8   : > { %v464_v27 = vpack.c.bf16 %v1418_v25, %v1416_v24 }
 0x1aa   : > { %1122 = vmatmul.mubr.msk.bf16.vlgmr.msra.gmra.mrb[0].mxu1 %vm445_vm2, %v464_v27 }
 0x1ab   : > { %1126 = vmatpush3.bf16.xpose.msra.mxu1 %v527_v26  ;;  %1127 = vmatprep.mubr.msk.bf16.mxu1 %vm1298_vm0, %v1297_v6 }
 0x1ac   : > { %1137 = vmatprep.subr.bf16.mxu1 %v1297_v6 }
 0x1b2   : > { %1128 = vmatmul.mubr.msk.bf16.vlgmr.msra.gmra.mrb[4].mxu1 %vm397_vm1, %v520_v28 }
 0x1b3   : > { %1138 = vmatpush3.bf16.xpose.msra.mxu1 %v648_v31  ;;  %1139 = vmatprep.mubr.msk.bf16.mxu1 %vm1298_vm0, %v1297_v6 }
 0x1b4   : > { %1149 = vmatprep.subr.bf16.mxu1 %v1297_v6 }
 0x1ba   : > { %1140 = vmatmul.mubr.msk.bf16.vlgmr.msra.gmra.mrb[8].mxu1 %vm397_vm1, %v641_v30 }
 0x1bb   : > { %1150 = vmatpush3.bf16.xpose.msra.mxu1 %v769_v33  ;;  %1151 = vmatprep.mubr.msk.bf16.mxu1 %vm1298_vm0, %v1297_v6 }
 0x1c2   : > { %1152 = vmatmul.mubr.msk.bf16.vlgmr.msra.gmra.mrb[12].mxu1 %vm397_vm1, %v762_v34 }
 0x27d   : > { %v1437_v35 = vpop.f32.mrb[0].mxu1 }
 0x27e   : > { %v1123_v36 = vpop.f32.mrb[1].mxu1 }
 0x27f   : > { %v1439_v37 = vpop.f32.mrb[2].mxu1 }
 0x280   : > { %v1124_v38 = vpop.f32.mrb[3].mxu1 }
 0x285   : > { %v563_v39 = vpop.f32.mrb[4].mxu1 }
 0x286   : > { %v1129_v40 = vpop.f32.mrb[5].mxu1  ;;  %v570_v41 = vsel %vm445_vm2, %v563_v39, -inf }
 0x287   : > { %571 = vmax.xlane.f32.xlu1 %v570_v41  ;;  %v566_v42 = vpop.f32.mrb[6].mxu1 }
 0x288   : > { %v1130_v43 = vpop.f32.mrb[7].mxu1  ;;  %v573_v44 = vsel %vm445_vm2, %v566_v42, -inf }
 0x289   : > { %574 = vmax.xlane.f32.xlu0 %v573_v44 }
 0x28d   : > { %v684_v45 = vpop.f32.mrb[8].mxu1 }
 0x28e   : > { %v1141_v46 = vpop.f32.mrb[9].mxu1  ;;  %v691_v47 = vsel %vm445_vm2, %v684_v45, -inf }
 0x28f   : > { %692 = vmax.xlane.f32.xlu1 %v691_v47  ;;  %v687_v48 = vpop.f32.mrb[10].mxu1 }
 0x290   : > { %v1142_v49 = vpop.f32.mrb[11].mxu1  ;;  %v694_v50 = vsel %vm445_vm2, %v687_v48, -inf }
 0x293   : > { %695 = vmax.xlane.f32.xlu1 %v694_v50 }
 0x295   : > { %v805_v51 = vpop.f32.mrb[12].mxu1 }
 0x296   : > { %v812_v52 = vsel %vm445_vm2, %v805_v51, -inf  ;;  %v1153_v53 = vpop.f32.mrb[13].mxu1 }
 0x297   : > { %813 = vmax.xlane.f32.xlu0 %v812_v52  ;;  %v808_v54 = vpop.f32.mrb[14].mxu1 }
 0x298   : > { %v1154_v55 = vpop.f32.mrb[15].mxu1  ;;  %v815_v56 = vsel %vm445_vm2, %v808_v54, -inf }
 0x2a4   : > { %710 = vrot.lane.b32.xlu1 %v1411_v16, %s1300_s27 }
 0x2ad   : > { %589 = vrot.lane.b32.xlu0 %v1411_v16, %s1299_s26 }
 0x2c8   : > { %816 = vmax.xlane.f32.xlu1 %v815_v56 }
 0x2d9   : > { %831 = vrot.lane.b32.xlu1 %v1411_v16, %s1301_s28 }
 0x314   : > { %v572_v57 = vpop.xlane.xlu1 %571 }
 0x315   : > { %v576_v58 = vsub.f32 %v563_v39, %v572_v57 }
 0x316   : > { %v575_v59 = vpop.xlane.xlu0 %574 }
 0x317   : > { %v578_v60 = vmul.f32 1.442695, %v576_v58  ;;  %v577_v61 = vsub.f32 %v566_v42, %v575_v59 }
 0x319   : > { %1229 = vpow2.f32 %v578_v60  ;;  %v580_v62 = vmul.f32 1.442695, %v577_v61 }
 0x31b   : > { %1231 = vpow2.f32 %v580_v62 }
 0x31c   : > { %v693_v63 = vpop.xlane.xlu1 %692 }
 0x31d   : > { %v697_v0 = vsub.f32 %v684_v45, %v693_v63 }
 0x31f   : > { %v699_v1 = vmul.f32 1.442695, %v697_v0 }
 0x320   : > { %v696_v2 = vpop.xlane.xlu1 %695 }
 0x321   : > { %1233 = vpow2.f32 %v699_v1  ;;  %v698_v3 = vsub.f32 %v687_v48, %v696_v2 }
 0x323   : > { %v1230_v4 = vpop.eup %1229  ;;  %v701_v5 = vmul.f32 1.442695, %v698_v3 }
 0x324   : > { %v814_v7 = vpop.xlane.xlu0 %813  ;;  %v582_v8 = vsel %vm445_vm2, %v1230_v4, 0.0  ;;  %v711_v16 = vpop.permute.xlu1 %710 }
 0x325   : > { %v1232_v9 = vpop.eup %1231  ;;  %1235 = vpow2.f32 %v701_v5  ;;  %v818_v10 = vsub.f32 %v805_v51, %v814_v7  ;;  %583 = vadd.xlane.f32.xlu0 %v582_v8 }
 0x326   : > { %v585_v11 = vsel %vm445_vm2, %v1232_v9, 0.0  ;;  %v588_v12 = vpack.c.bf16 %v1232_v9, %v1230_v4 }
 0x327   : > { %v820_v13 = vmul.f32 1.442695, %v818_v10  ;;  %586 = vadd.xlane.f32.xlu1 %v585_v11 }
 0x328   : > { %v590_v14 = vpop.permute.xlu0 %589 }
 0x329   : > { %1237 = vpow2.f32 %v820_v13  ;;  %1132 = vmatpush3.bf16.msra.mxu0 %v590_v14 }
 0x32a   : > { %1143 = vmatprep.subr.bf16.mxu0 %v1297_v6 }
 0x32b   : > { %v1234_v15 = vpop.eup %1233 }
 0x32c   : > { %1134 = vmatmul.mubr.msk.bf16.vlgmr.msra.gmra.mrb[4].mxu0 %vm445_vm2, %v588_v12  ;;  %v703_v17 = vsel %vm445_vm2, %v1234_v15, 0.0 }
 0x32d   : > { %704 = vadd.xlane.f32.xlu0 %v703_v17  ;;  %1144 = vmatpush3.bf16.msra.mxu0 %v711_v16 }
 0x32e   : > { %1145 = vmatprep.mubr.msk.bf16.mxu0 %vm1298_vm0, %v1297_v6  ;;  %1155 = vmatprep.subr.bf16.mxu0 %v1297_v6 }
 0x32f   : > { %v1236_v18 = vpop.eup %1235 }
 0x330   : > { %v706_v19 = vsel %vm445_vm2, %v1236_v18, 0.0  ;;  %v709_v20 = vpack.c.bf16 %v1236_v18, %v1234_v15 }
 0x331   : > { %707 = vadd.xlane.f32.xlu0 %v706_v19 }
 0x333   : > { %v1238_v21 = vpop.eup %1237 }
 0x334   : > { %1146 = vmatmul.mubr.msk.bf16.vlgmr.msra.gmra.mrb[8].mxu0 %vm445_vm2, %v709_v20  ;;  %v824_v22 = vsel %vm445_vm2, %v1238_v21, 0.0 }
 0x335   : > { %825 = vadd.xlane.f32.xlu1 %v824_v22  ;;  %1157 = vmatprep.mubr.msk.bf16.mxu0 %vm1298_vm0, %v1297_v6  ;;  %v461_v6 = vsel %vm445_vm2, %v1418_v25, 0.0 }
 0x339   : > { %459 = vadd.xlane.f32.xlu1 %v458_v23 }
 0x355   : > { %v817_v26 = vpop.xlane.xlu1 %816 }
 0x356   : > { %v819_v27 = vsub.f32 %v808_v54, %v817_v26 }
 0x358   : > { %v822_v28 = vmul.f32 1.442695, %v819_v27 }
 0x359   : > { %v832_v29 = vpop.permute.xlu1 %831 }
 0x35a   : > { %1239 = vpow2.f32 %v822_v28  ;;  %1156 = vmatpush3.bf16.msra.mxu0 %v832_v29 }
 0x364   : > { %v1240_v30 = vpop.eup %1239 }
 0x365   : > { %v827_v31 = vsel %vm445_vm2, %v1240_v30, 0.0  ;;  %v830_v32 = vpack.c.bf16 %v1240_v30, %v1238_v21 }
 0x366   : > { %828 = vadd.xlane.f32.xlu0 %v827_v31 }
 0x367   : > { %1158 = vmatmul.mubr.msk.bf16.vlgmr.msra.gmra.mrb[12].mxu0 %vm445_vm2, %v830_v32 }
 0x36a   : > { %462 = vadd.xlane.f32.xlu0 %v461_v6 }
 0x3b2   : > { %v584_v33 = vpop.xlane.xlu0 %583 }
 0x3b3   : > { %1241 = vrcp.f32 %v584_v33 }
 0x3b4   : > { %v587_v24 = vpop.xlane.xlu1 %586 }
 0x3b5   : > { %1243 = vrcp.f32 %v587_v24 }
 0x3ba   : > { %v705_v34 = vpop.xlane.xlu0 %704 }
 0x3bb   : > { %1245 = vrcp.f32 %v705_v34 }
 0x3bd   : > { %v1242_v39 = vpop.eup %1241 }
 0x3be   : > { %v708_v36 = vpop.xlane.xlu0 %707 }
 0x3bf   : > { %1247 = vrcp.f32 %v708_v36  ;;  %v1244_v41 = vpop.eup %1243 }
 0x3c2   : > { %v826_v55 = vpop.xlane.xlu1 %825 }
 0x3c3   : > { %1249 = vrcp.f32 %v826_v55 }
 0x3c5   : > { %v1246_v47 = vpop.eup %1245 }
 0x3c6   : > { %v460_v2 = vpop.xlane.xlu1 %459 }
 0x3c9   : > { %v1248_v49 = vpop.eup %1247 }
 0x3cd   : > { %v1250_v58 = vpop.eup %1249 }
 0x3f3   : > { %v829_v56 = vpop.xlane.xlu0 %828 }
 0x3f4   : > { %1251 = vrcp.f32 %v829_v56 }
 0x3f5   : > { %1253 = vrcp.f32 %v460_v2 }
 0x3f7   : > { %v463_v3 = vpop.xlane.xlu0 %462 }
 0x3f8   : > { %1255 = vrcp.f32 %v463_v3 }
 0x3fe   : > { %v1252_v60 = vpop.eup %1251 }
 0x3ff   : > { %v629_v38 = vpop.f32.mrb[4].mxu0  ;;  %v1254_v5 = vpop.eup %1253 }
 0x400   : > { %v1135_v40 = vpop.f32.mrb[5].mxu0  ;;  %v638_v43 = vmul.f32 %v1242_v39, %v629_v38  ;;  %v517_v13 = vmul.f32 %v1254_v5, %v1437_v35 }
 0x401   : > { %v632_v42 = vpop.f32.mrb[6].mxu0 }
 0x402   : > { %v639_v44 = vmul.f32 %v1244_v41, %v632_v42  ;;  %v1136_v45 = vpop.f32.mrb[7].mxu0  ;;  %v1256_v8 = vpop.eup %1255 }
 0x403   : > { %v518_v14 = vmul.f32 %v1256_v8, %v1439_v37 }
 0x404   : > { %v1207_v46 = vpack.i.bf16 %v639_v44, %v638_v43 }
 0x406   : > { %1208 = vrot.lane.b32.xlu1 %v1207_v46, %s1301_s28 }
 0x407   : > { %v750_v25 = vpop.f32.mrb[8].mxu0 }
 0x408   : > { %v1147_v48 = vpop.f32.mrb[9].mxu0  ;;  %v759_v51 = vmul.f32 %v1246_v47, %v750_v25 }
 0x409   : > { %v753_v50 = vpop.f32.mrb[10].mxu0 }
 0x40a   : > { %v760_v52 = vmul.f32 %v1248_v49, %v753_v50  ;;  %v1148_v53 = vpop.f32.mrb[11].mxu0 }
 0x40c   : > { %v1212_v54 = vpack.i.bf16 %v760_v52, %v759_v51 }
 0x40e   : > { %1213 = vrot.lane.b32.xlu0 %v1212_v54, %s1300_s27 }
 0x43a   : > { %v871_v57 = vpop.f32.mrb[12].mxu0 }
 0x43b   : > { %v1159_v59 = vpop.f32.mrb[13].mxu0  ;;  %v880_v62 = vmul.f32 %v1250_v58, %v871_v57 }
 0x43c   : > { %v874_v61 = vpop.f32.mrb[14].mxu0 }
 0x43d   : > { %v881_v63 = vmul.f32 %v1252_v60, %v874_v61  ;;  %v1160_v0 = vpop.f32.mrb[15].mxu0 }
 0x43f   : > { %v1217_v1 = vpack.i.bf16 %v881_v63, %v880_v62 }
 0x441   : > { %1218 = vrot.lane.b32.xlu1 %v1217_v1, %s1299_s26 }
 0x478   : > { %v1209_v4 = vpop.permute.xlu1 %1208 }
 0x479   : > { %v1211_v9 = vunpack.i.h.bf16 %v1209_v4  ;;  %v1210_v10 = vunpack.i.l.bf16 %v1209_v4 }
 0x47b   : > { %v907_v16 = vsel %vm397_vm1, %v518_v14, %v1211_v9  ;;  %v906_v17 = vsel %vm397_vm1, %v517_v13, %v1210_v10 }
 0x480   : > { %v1214_v7 = vpop.permute.xlu0 %1213 }
 0x481   : > { %v1216_v11 = vunpack.i.h.bf16 %v1214_v7  ;;  %v1215_v12 = vunpack.i.l.bf16 %v1214_v7 }
 0x483   : > { %v910_v20 = vsel %vm908_vm3, %v907_v16, %v1216_v11  ;;  %v909_v21 = vsel %vm908_vm3, %v906_v17, %v1215_v12 }
 0x4b3   : > { %v1219_v15 = vpop.permute.xlu1 %1218 }
 0x4b4   : > { %v1221_v18 = vunpack.i.h.bf16 %v1219_v15  ;;  %v1220_v19 = vunpack.i.l.bf16 %v1219_v15 }
 0x4b6   : > { %v913_v22 = vsel %vm911_vm4, %v910_v20, %v1221_v18  ;;  %v912_v35 = vsel %vm911_vm4, %v909_v21, %v1220_v19 }
 0x4b7   : > { %v1095_v23 = vpack.c.bf16 %v913_v22, %v912_v35 }
 0x4b9   : > { %1096 = vst [vmem:[%s378_s6] sm:$0xff] %v1095_v23  }
 0x4ba PF: > { %s13_s16 = sadd.s32 1, %s1295_s16   ;;  %s1504_s12 = smov %s1283_s13 }
 0x4bb   : > { %p10_p10 = scmp.ge.s32.totalorder %s13_s16, 4   ;;  %s1505_s13 = smov %s1361_s21 }
 0x4bc   : > { %s1506_s14 = smov %s1291_s15  ;;  %s1507_s15 = smov %s1509_s17 }
 0x4bd   :  { %12 = sbr.rel (!%p10_p10) target bundleno = 3 (0x3), region = 206 }

// kernel: xlmr_extract_features.13
= control target key start
LH: loop header
LB: loop body
LE: loop exit
PB: predicated region body
PF: predicated region fallthrough
CT: control target
= control target key end

     0   :  { %v684_v1 = vmov 0   ;;  %v49_v35 = vlaneseq  ;;  %s855_s1 = inlined_call_operand.vmem [shape: bf16[128,256], index: 1, kind: input, shape index: {}]   ;;  %s856_s3 = inlined_call_operand.vmem [shape: bf16[256,128], index: 3, kind: input, shape index: {}]   ;;  %s857_s0 = inlined_call_operand.vmem [shape: bf16[32,128], index: 0, kind: input, shape index: {}]   ;;  %s858_s2 = inlined_call_operand.vmem [shape: f32[1,256], index: 2, kind: input, shape index: {}]   ;;  %s859_s4 = inlined_call_operand.vmem [shape: f32[1,128], index: 4, kind: input, shape index: {}]   ;;  %s860_s5 = inlined_call_operand.vmem [shape: f32[1,128], index: 5, kind: input, shape index: {}]   ;;  %s861_s6 = inlined_call_operand.vmem [shape: f32[1,128], index: 6, kind: input, shape index: {}]   ;;  %s862_s7 = inlined_call_operand.vmem [shape: bf16[32,128], index: 7, kind: output, shape index: {}]  }
   0x1   :  { %v616_v0 = vld [vmem:[%s855_s1 + $0x4] ss:$8 sps:$4 sm:$0xff]   ;;  %183 = vmatprep.mubr.bf16.mxu0 %v684_v1  ;;  %v618_v2 = vld [vmem:[%s855_s1] ss:$8 sps:$4 sm:$0xff]   ;;  %v619_v3 = vld [vmem:[%s855_s1 + $0x14] ss:$8 sps:$4 sm:$0xff]  }
   0x2   :  { %151 = vmatprep.subr.bf16.mxu0 %v616_v0  ;;  %v621_v4 = vld [vmem:[%s855_s1 + $0x10] ss:$8 sps:$4 sm:$0xff]   ;;  %v622_v5 = vld [vmem:[%s855_s1 + $0x24] ss:$8 sps:$4 sm:$0xff]   ;;  %v624_v6 = vld [vmem:[%s855_s1 + $0x20] ss:$8 sps:$4 sm:$0xff]  }
   0x3   :  { %152 = vmatpush1.bf16.msra.mxu0 %v618_v2  ;;  %v625_v7 = vld [vmem:[%s855_s1 + $0x34] ss:$8 sps:$4 sm:$0xff]   ;;  %v627_v8 = vld [vmem:[%s855_s1 + $0x30] ss:$8 sps:$4 sm:$0xff]   ;;  %v628_v9 = vld [vmem:[%s855_s1 + $0x44] ss:$8 sps:$4 sm:$0xff]  }
   0x4   :  { %153 = vmatprep.subr.bf16.mxu0 %v619_v3  ;;  %v642_v10 = vld [vmem:[%s856_s3 + $0x40] sm:$0xff]   ;;  %v644_v13 = vld [vmem:[%s856_s3 + $0x48] sm:$0xff]   ;;  %v631_v14 = vld [vmem:[%s855_s1 + $0x54] ss:$8 sps:$4 sm:$0xff]   ;;  %v50_v36 = vshrl.u32 %v49_v35, 7 }
   0x5   :  { %v630_v11 = vld [vmem:[%s855_s1 + $0x40] ss:$8 sps:$4 sm:$0xff]   ;;  %587 = vmatprep.subr.bf16.mxu1 %v642_v10  ;;  %v633_v16 = vld [vmem:[%s855_s1 + $0x50] ss:$8 sps:$4 sm:$0xff]   ;;  %v634_v17 = vld [vmem:[%s855_s1 + $0x64] ss:$8 sps:$4 sm:$0xff]  }
   0x6   :  { %v643_v12 = vld [vmem:[%s856_s3] sm:$0xff]   ;;  %v645_v15 = vld [vmem:[%s856_s3 + $0x8] sm:$0xff]   ;;  %v637_v19 = vld [vmem:[%s855_s1 + $0x74] ss:$8 sps:$4 sm:$0xff]   ;;  %v51_v37 = vsub.s32 0, %v50_v36  ;;  %v55_v39 = vsub.s32 1, %v50_v36 }
   0x7   :  { %154 = vmatpush1.bf16.msra.mxu0 %v621_v4  ;;  %588 = vmatpush3.bf16.msra.mxu1 %v643_v12  ;;  %v636_v18 = vld [vmem:[%s855_s1 + $0x60] ss:$8 sps:$4 sm:$0xff]   ;;  %v639_v20 = vld [vmem:[%s855_s1 + $0x70] ss:$8 sps:$4 sm:$0xff]  }
   0x8   :  { %155 = vmatprep.subr.bf16.mxu0 %v622_v5  ;;  %589 = vmatprep.subr.bf16.mxu1 %v644_v13  ;;  %v788_v21 = vld [vmem:[%s857_s0] sm:$0xff]   ;;  %v794_v22 = vld [vmem:[%s857_s0 + $0x8] sm:$0xff]   ;;  %v646_v23 = vld [vmem:[%s856_s3 + $0x50] sm:$0xff]  }
   0x9   :  { %v647_v24 = vld [vmem:[%s856_s3 + $0x10] sm:$0xff]   ;;  %v648_v25 = vld [vmem:[%s856_s3 + $0x58] sm:$0xff]   ;;  %v650_v27 = vld [vmem:[%s856_s3 + $0x60] sm:$0xff]  }
   0xa   :  { %v649_v26 = vld [vmem:[%s856_s3 + $0x18] sm:$0xff]   ;;  %v651_v28 = vld [vmem:[%s856_s3 + $0x20] sm:$0xff]   ;;  %v652_v29 = vld [vmem:[%s856_s3 + $0x68] sm:$0xff]  }
   0xb   :  { %156 = vmatpush1.bf16.msra.mxu0 %v624_v6  ;;  %590 = vmatpush3.bf16.msra.mxu1 %v645_v15  ;;  %v653_v30 = vld [vmem:[%s856_s3 + $0x28] sm:$0xff]   ;;  %v654_v31 = vld [vmem:[%s856_s3 + $0x70] sm:$0xff]   ;;  %v656_v33 = vld [vmem:[%s856_s3 + $0x78] sm:$0xff]  }
   0xc   :  { %157 = vmatprep.subr.bf16.mxu0 %v625_v7  ;;  %591 = vmatprep.subr.bf16.mxu1 %v646_v23  ;;  %v655_v32 = vld [vmem:[%s856_s3 + $0x30] sm:$0xff]   ;;  %v657_v34 = vld [vmem:[%s856_s3 + $0x38] sm:$0xff]   ;;  %v47_v38 = vld [vmem:[%s858_s2] sm:$0x3] }
   0xd   :  { %v52_v40 = vrot.slane %v47_v38, %v51_v37  ;;  %v56_v41 = vrot.slane %v47_v38, %v55_v39 }
   0xf   :  { %158 = vmatpush1.bf16.msra.mxu0 %v627_v8  ;;  %592 = vmatpush3.bf16.msra.mxu1 %v647_v24 }
  0x10   :  { %159 = vmatprep.subr.bf16.mxu0 %v628_v9  ;;  %593 = vmatprep.subr.bf16.mxu1 %v648_v25 }
  0x13   :  { %160 = vmatpush1.bf16.msra.mxu0 %v630_v11  ;;  %594 = vmatpush3.bf16.msra.mxu1 %v649_v26 }
  0x14   :  { %161 = vmatprep.subr.bf16.mxu0 %v631_v14  ;;  %595 = vmatprep.subr.bf16.mxu1 %v650_v27 }
  0x17   :  { %162 = vmatpush1.bf16.msra.mxu0 %v633_v16  ;;  %596 = vmatpush3.bf16.msra.mxu1 %v651_v28 }
  0x18   :  { %163 = vmatprep.subr.bf16.mxu0 %v634_v17  ;;  %597 = vmatprep.subr.bf16.mxu1 %v652_v29 }
  0x1b   :  { %164 = vmatpush1.bf16.msra.mxu0 %v636_v18  ;;  %598 = vmatpush3.bf16.msra.mxu1 %v653_v30 }
  0x1c   :  { %165 = vmatprep.subr.bf16.mxu0 %v637_v19  ;;  %599 = vmatprep.subr.bf16.mxu1 %v654_v31 }
  0x1f   :  { %166 = vmatpush1.bf16.msra.mxu0 %v639_v20  ;;  %600 = vmatpush3.bf16.msra.mxu1 %v655_v32 }
  0x20   :  { %601 = vmatprep.subr.bf16.mxu1 %v656_v33 }
  0x22   :  { %184 = vmatmul.mubr.bf16.vlgmr.msra.gmra.mrb[0].mxu0 %v788_v21 }
  0x23   :  { %193 = vmatprep.mubr.bf16.mxu0 %v684_v1  ;;  %602 = vmatpush3.bf16.msra.mxu1 %v657_v34 }
  0x2a   :  { %194 = vmatmul.mubr.bf16.gmra.mrb[4].mxu0 %v794_v22 }
  0xf5   :  { %v185_v42 = vpop.f32.mrb[0].mxu0 }
  0xf6   :  { %v186_v43 = vadd.f32 %v185_v42, %v52_v40  ;;  %v187_v44 = vpop.f32.mrb[1].mxu0 }
  0xf7   :  { %v188_v45 = vadd.f32 %v187_v44, %v56_v41  ;;  %v189_v46 = vpop.f32.mrb[2].mxu0 }
  0xf8   :  { %v212_v47 = vmul.f32 0.70710677, %v186_v43  ;;  %v190_v48 = vadd.f32 %v189_v46, %v52_v40  ;;  %v191_v49 = vpop.f32.mrb[3].mxu0  ;;  %v204_v8 = vmul.f32 0.5, %v186_v43 }
  0xf9   :  { %v213_v50 = vmul.f32 0.70710677, %v188_v45  ;;  %v192_v51 = vadd.f32 %v191_v49, %v56_v41  ;;  %v205_v11 = vmul.f32 0.5, %v188_v45  ;;  %v432_v45 = vunpack.c.l.bf16 %v788_v21 }
  0xfa   :  { %660 = verf.f32 %v212_v47  ;;  %v214_v52 = vmul.f32 0.70710677, %v190_v48  ;;  %v206_v9 = vmul.f32 0.5, %v190_v48 }
  0xfb   :  { %662 = verf.f32 %v213_v50  ;;  %v215_v53 = vmul.f32 0.70710677, %v192_v51  ;;  %v207_v12 = vmul.f32 0.5, %v192_v51  ;;  %v433_v51 = vunpack.c.h.bf16 %v788_v21 }
  0xfc   :  { %664 = verf.f32 %v214_v52 }
  0xfd   :  { %666 = verf.f32 %v215_v53  ;;  %v195_v54 = vpop.f32.mrb[4].mxu0 }
  0xfe   :  { %v196_v55 = vadd.f32 %v195_v54, %v52_v40  ;;  %v197_v56 = vpop.f32.mrb[5].mxu0 }
  0xff   :  { %v198_v57 = vadd.f32 %v197_v56, %v56_v41  ;;  %v199_v58 = vpop.f32.mrb[6].mxu0 }
 0x100   :  { %v216_v59 = vmul.f32 0.70710677, %v196_v55  ;;  %v200_v60 = vadd.f32 %v199_v58, %v52_v40  ;;  %v201_v61 = vpop.f32.mrb[7].mxu0  ;;  %v208_v28 = vmul.f32 0.5, %v196_v55 }
 0x101   :  { %v217_v62 = vmul.f32 0.70710677, %v198_v57  ;;  %v202_v63 = vadd.f32 %v201_v61, %v56_v41  ;;  %v209_v31 = vmul.f32 0.5, %v198_v57  ;;  %v549_v41 = vld [vmem:[%s859_s4] ss:$0 sm:$0xff]  ;;  %v434_v57 = vunpack.c.l.bf16 %v794_v22 }
 0x102   :  { %668 = verf.f32 %v216_v59  ;;  %v218_v0 = vmul.f32 0.70710677, %v200_v60  ;;  %v210_v29 = vmul.f32 0.5, %v200_v60 }
 0x103   :  { %670 = verf.f32 %v217_v62  ;;  %v219_v1 = vmul.f32 0.70710677, %v202_v63  ;;  %v211_v32 = vmul.f32 0.5, %v202_v63  ;;  %v435_v63 = vunpack.c.h.bf16 %v794_v22 }
 0x104   :  { %v661_v2 = vpop.eup %660  ;;  %672 = verf.f32 %v218_v0 }
 0x105   :  { %v663_v3 = vpop.eup %662  ;;  %v228_v4 = vadd.f32 1.0, %v661_v2  ;;  %674 = verf.f32 %v219_v1 }
 0x106   :  { %v665_v5 = vpop.eup %664  ;;  %v229_v6 = vadd.f32 1.0, %v663_v3 }
 0x107   :  { %v667_v7 = vpop.eup %666  ;;  %v230_v10 = vadd.f32 1.0, %v665_v5  ;;  %v236_v14 = vmul.f32 %v228_v4, %v204_v8 }
 0x108   :  { %v231_v13 = vadd.f32 1.0, %v667_v7  ;;  %v237_v16 = vmul.f32 %v229_v6, %v205_v11 }
 0x109   :  { %v238_v15 = vmul.f32 %v230_v10, %v206_v9 }
 0x10a   :  { %v239_v17 = vmul.f32 %v231_v13, %v207_v12 }
 0x10b   :  { %v244_v18 = vpack.c.bf16 %v238_v15, %v236_v14 }
 0x10c   :  { %v669_v19 = vpop.eup %668  ;;  %v245_v20 = vpack.c.bf16 %v239_v17, %v237_v16 }
 0x10d   :  { %v671_v23 = vpop.eup %670  ;;  %v232_v24 = vadd.f32 1.0, %v669_v19 }
 0x10e   :  { %v673_v25 = vpop.eup %672  ;;  %v233_v26 = vadd.f32 1.0, %v671_v23  ;;  %415 = vmatprep.mubr.bf16.mxu1 %v245_v20 }
 0x10f   :  { %v675_v27 = vpop.eup %674  ;;  %v234_v30 = vadd.f32 1.0, %v673_v25  ;;  %416 = vmatmul.mubr.bf16.vlgmr.msra.gmra.mrb[0].mxu1 %v244_v18  ;;  %v240_v34 = vmul.f32 %v232_v24, %v208_v28 }
 0x110   :  { %v235_v33 = vadd.f32 1.0, %v675_v27  ;;  %v241_v36 = vmul.f32 %v233_v26, %v209_v31  ;;  %v566_v31 = vld [vmem:[%s860_s5] ss:$0 sm:$0xff] }
 0x111   :  { %v242_v35 = vmul.f32 %v234_v30, %v210_v29 }
 0x112   :  { %v243_v37 = vmul.f32 %v235_v33, %v211_v32 }
 0x113   :  { %v246_v38 = vpack.c.bf16 %v242_v35, %v240_v34  ;;  %v567_v35 = vld [vmem:[%s861_s6] ss:$0 sm:$0xff] }
 0x114   :  { %v247_v39 = vpack.c.bf16 %v243_v37, %v241_v36 }
 0x116   :  { %423 = vmatprep.mubr.bf16.mxu1 %v247_v39 }
 0x117   :  { %424 = vmatmul.mubr.bf16.gmra.mrb[4].mxu1 %v246_v38 }
 0x1e2   :  { %v603_v40 = vpop.f32.mrb[0].mxu1 }
 0x1e3   :  { %v604_v42 = vpop.f32.mrb[1].mxu1 }
 0x1e4   :  { %v605_v43 = vadd.f32 %v604_v42, %v603_v40  ;;  %v606_v44 = vpop.f32.mrb[2].mxu1 }
 0x1e5   :  { %v607_v46 = vpop.f32.mrb[3].mxu1 }
 0x1e6   :  { %v418_v47 = vadd.f32 %v605_v43, %v549_v41  ;;  %v608_v48 = vadd.f32 %v607_v46, %v606_v44 }
 0x1e8   :  { %v421_v49 = vadd.f32 %v608_v48, %v549_v41  ;;  %v436_v50 = vadd.f32 %v432_v45, %v418_v47 }
 0x1ea   :  { %v609_v52 = vpop.f32.mrb[4].mxu1  ;;  %440 = vadd.xlane.f32.xlu0 %v436_v50  ;;  %v437_v56 = vadd.f32 %v433_v51, %v421_v49 }
 0x1eb   :  { %v610_v53 = vpop.f32.mrb[5].mxu1 }
 0x1ec   :  { %v611_v54 = vadd.f32 %v610_v53, %v609_v52  ;;  %v612_v55 = vpop.f32.mrb[6].mxu1 }
 0x1ed   :  { %v613_v58 = vpop.f32.mrb[7].mxu1 }
 0x1ee   :  { %v426_v59 = vadd.f32 %v611_v54, %v549_v41  ;;  %v614_v60 = vadd.f32 %v613_v58, %v612_v55  ;;  %442 = vadd.xlane.f32.xlu0 %v437_v56 }
 0x1f0   :  { %v429_v61 = vadd.f32 %v614_v60, %v549_v41  ;;  %v438_v62 = vadd.f32 %v434_v57, %v426_v59 }
 0x1f2   :  { %444 = vadd.xlane.f32.xlu1 %v438_v62  ;;  %v439_v0 = vadd.f32 %v435_v63, %v429_v61 }
 0x1f6   :  { %446 = vadd.xlane.f32.xlu1 %v439_v0 }
 0x277   :  { %v441_v21 = vpop.xlane.xlu0 %440 }
 0x278   :  { %v449_v1 = vmul.f32 0.0078125, %v441_v21 }
 0x27a   :  { %v453_v2 = vsub.f32 %v436_v50, %v449_v1 }
 0x27b   :  { %v443_v3 = vpop.xlane.xlu0 %442 }
 0x27c   :  { %v450_v4 = vmul.f32 0.0078125, %v443_v3  ;;  %v457_v5 = vmul.f32 %v453_v2, %v453_v2 }
 0x27e   :  { %v454_v6 = vsub.f32 %v437_v56, %v450_v4  ;;  %461 = vadd.xlane.f32.xlu0 %v457_v5 }
 0x27f   :  { %v445_v7 = vpop.xlane.xlu1 %444 }
 0x280   :  { %v451_v8 = vmul.f32 0.0078125, %v445_v7  ;;  %v458_v9 = vmul.f32 %v454_v6, %v454_v6 }
 0x282   :  { %v455_v10 = vsub.f32 %v438_v62, %v451_v8  ;;  %463 = vadd.xlane.f32.xlu1 %v458_v9 }
 0x283   :  { %v447_v11 = vpop.xlane.xlu1 %446 }
 0x284   :  { %v452_v12 = vmul.f32 0.0078125, %v447_v11  ;;  %v459_v13 = vmul.f32 %v455_v10, %v455_v10 }
 0x286   :  { %v456_v22 = vsub.f32 %v439_v0, %v452_v12  ;;  %465 = vadd.xlane.f32.xlu0 %v459_v13 }
 0x288   :  { %v460_v14 = vmul.f32 %v456_v22, %v456_v22 }
 0x28a   :  { %467 = vadd.xlane.f32.xlu1 %v460_v14 }
 0x30b   :  { %v462_v15 = vpop.xlane.xlu0 %461 }
 0x30c   :  { %v469_v16 = vmul.f32 0.0078125, %v462_v15 }
 0x30e   :  { %v473_v17 = vadd.f32 1e-05, %v469_v16 }
 0x30f   :  { %v464_v18 = vpop.xlane.xlu1 %463 }
 0x310   :  { %676 = vrsqrt.f32 %v473_v17  ;;  %v470_v19 = vmul.f32 0.0078125, %v464_v18 }
 0x312   :  { %v474_v20 = vadd.f32 1e-05, %v470_v19 }
 0x313   :  { %v466_v23 = vpop.xlane.xlu0 %465 }
 0x314   :  { %678 = vrsqrt.f32 %v474_v20  ;;  %v471_v24 = vmul.f32 0.0078125, %v466_v23 }
 0x316   :  { %v475_v25 = vadd.f32 1e-05, %v471_v24 }
 0x317   :  { %v468_v26 = vpop.xlane.xlu1 %467 }
 0x318   :  { %680 = vrsqrt.f32 %v475_v25  ;;  %v472_v27 = vmul.f32 0.0078125, %v468_v26 }
 0x31a   :  { %v677_v28 = vpop.eup %676  ;;  %v476_v29 = vadd.f32 1e-05, %v472_v27 }
 0x31b   :  { %v481_v30 = vmul.f32 %v677_v28, %v453_v2 }
 0x31c   :  { %682 = vrsqrt.f32 %v476_v29 }
 0x31d   :  { %v492_v33 = vmul.f32 %v566_v31, %v481_v30 }
 0x31e   :  { %v679_v32 = vpop.eup %678 }
 0x31f   :  { %v482_v34 = vmul.f32 %v679_v32, %v454_v6  ;;  %v503_v38 = vadd.f32 %v567_v35, %v492_v33 }
 0x321   :  { %v493_v36 = vmul.f32 %v566_v31, %v482_v34 }
 0x322   :  { %v681_v37 = vpop.eup %680 }
 0x323   :  { %v504_v39 = vadd.f32 %v567_v35, %v493_v36  ;;  %v483_v40 = vmul.f32 %v681_v37, %v455_v10 }
 0x325   :  { %v579_v41 = vpack.c.bf16 %v504_v39, %v503_v38  ;;  %v494_v43 = vmul.f32 %v566_v31, %v483_v40 }
 0x326   :  { %v683_v42 = vpop.eup %682 }
 0x327   :  { %580 = vst [vmem:[%s862_s7] sm:$0xff] %v579_v41   ;;  %v484_v44 = vmul.f32 %v683_v42, %v456_v22  ;;  %v505_v46 = vadd.f32 %v567_v35, %v494_v43 }
 0x329   :  { %v495_v45 = vmul.f32 %v566_v31, %v484_v44 }
 0x32b   :  { %v506_v47 = vadd.f32 %v567_v35, %v495_v45 }
 0x32d   :  { %v584_v48 = vpack.c.bf16 %v506_v47, %v505_v46 }
 0x32f   :  { %586 = vst [vmem:[%s862_s7 + $0x8] sm:$0xff] %v584_v48  }

</bundles_post_ra>
